<compile_context>
chip_gen: v5e
topology: v5e:2x2
jax: 0.10.0
libtpu: 0.0.40
codegen_flags: <defaults>
</compile_context>

<pallas_src>
import functools

import jax
import jax.numpy as jnp
from jax import lax
from jax.experimental import pallas as pl
from jax.experimental.pallas import tpu as pltpu

EPS = 0.0001
_NEG_BIG = -1e30
_VMEM_LIMIT = 48 * 1024 * 1024   # fits v7x 64 MiB physical with headroom


def _round_up(x, m):
    return (x + m - 1) // m * m


def _dense(x, w_ref, b_ref):
    """x @ W + b with bf16 MXU operands and f32 accumulation."""
    return jnp.dot(x.astype(jnp.bfloat16), w_ref[...],
                   preferred_element_type=jnp.float32) + b_ref[...]


def _pass1_kernel(num_layers, b_pad, *refs):
    """Per-tile logits (lane-dense) + online per-graph max / sum-of-exp."""
    idx = 0
    batch_row_ref = refs[idx]; idx += 1        # [1, tn] int32 (graph id per cand)
    q_ref = refs[idx]; idx += 1                # [b_pad, D] bf16 per-graph embedding
    k_ref = refs[idx]; idx += 1                # [tn, D]   bf16 per-cand embedding
    enc = []
    for _ in range(num_layers):
        enc.append(tuple(refs[idx:idx + 4])); idx += 4        # wq, bq, wk, bk
    wqf, bqf, wkf, bkf = refs[idx:idx + 4]; idx += 4
    f1_wq, f1_wk, f1_b, f2_w, f2_b = refs[idx:idx + 5]; idx += 5
    logits_ref = refs[idx]; idx += 1           # [1, tn]    f32 (lane-dense out)
    m_ref = refs[idx]; idx += 1                # [b_pad, 1] f32 running max (per split)
    l_ref = refs[idx]; idx += 1                # [b_pad, 1] f32 running sum(exp)
    hq_ref = refs[idx]                         # [b_pad, dk] bf16 scratch

    i = pl.program_id(1)                       # inner (arbitrary) tile index

    @pl.when(i == 0)
    def _init():
        m_ref[...] = jnp.full_like(m_ref, _NEG_BIG)
        l_ref[...] = jnp.zeros_like(l_ref)
        # Q path once per split (tiny [b_pad, D]); relu + f1_wq hoisted so the
        # expensive part never runs at per-candidate width.
        Q = q_ref[...]
        for wq, bq, _, _ in enc:
            Q = jnp.maximum(_dense(Q, wq, bq), 0.0)
        Qf = _dense(Q, wqf, bqf)                                       # [b_pad, dk]
        hq = jnp.dot(jnp.maximum(Qf, 0.0).astype(jnp.bfloat16), f1_wq[...],
                     preferred_element_type=jnp.float32)
        hq_ref[...] = hq.astype(jnp.bfloat16)

    # ---- K path on this candidate tile ----
    K = k_ref[...]
    for _, _, wk, bk in enc:
        K = jnp.maximum(_dense(K, wk, bk), 0.0)
    Kf = _dense(K, wkf, bkf)                                           # [tn, dk]

    tn = batch_row_ref.shape[1]
    b_row = batch_row_ref[...]                                         # [1, tn]
    mask_bn = lax.broadcasted_iota(jnp.int32, (b_pad, tn), 0) == b_row  # [b_pad, tn]
    mask_bn_f = mask_bn.astype(jnp.float32)

    # final_layers[0]: relu(cat(Q_exp, K)) @ W1 + b1.  The Q half is the one-hot
    # expansion of the already-(relu . @W1q)-transformed per-graph rows, realized
    # as a transposed contraction (no separate batch_col / mask_nb stream).
    q_exp = lax.dot_general(mask_bn.astype(jnp.bfloat16), hq_ref[...],
                            (((0,), (0,)), ((), ())),
                            preferred_element_type=jnp.float32)        # [tn, dk]
    h = (q_exp
         + jnp.dot(jnp.maximum(Kf, 0.0).astype(jnp.bfloat16), f1_wk[...],
                   preferred_element_type=jnp.float32)
         + f1_b[...])                                                  # [tn, dk]
    rh = jnp.maximum(h, 0.0).astype(jnp.bfloat16)

    # final_layers[1]: lane-dense logits row  w2 @ rh^T  (contract last dims).
    logits = (lax.dot_general(f2_w[...], rh, (((1,), (1,)), ((), ())),
                              preferred_element_type=jnp.float32)
              + f2_b[...])                                             # [1, tn]
    logits_ref[...] = logits

    # Online per-graph (segment) max / sum-of-exp accumulation.
    masked = jnp.where(mask_bn, logits, _NEG_BIG)                      # [b_pad, tn]
    tile_max = jnp.max(masked, axis=1, keepdims=True)                  # [b_pad, 1]
    m_old = m_ref[...]
    m_new = jnp.maximum(m_old, tile_max)
    m_cand = jnp.sum(mask_bn_f * m_new, axis=0, keepdims=True)         # [1, tn]
    ex = jnp.exp(logits - m_cand)                                      # [1, tn]
    tile_sum = jnp.sum(mask_bn_f * ex, axis=1, keepdims=True)          # [b_pad, 1]
    l_ref[...] = l_ref[...] * jnp.exp(m_old - m_new) + tile_sum
    m_ref[...] = m_new


def _pass2_kernel(b_pad, batch_row_ref, logits_ref, m_ref, l_ref, probs_ref):
    """probs = exp(logit - max_g) * (1 / (sum_g exp + EPS)), lane-dense per tile."""
    tn = batch_row_ref.shape[1]
    b_row = batch_row_ref[...]
    mask_f = (lax.broadcasted_iota(jnp.int32, (b_pad, tn), 0) == b_row
              ).astype(jnp.float32)                                    # [b_pad, tn]
    inv = pl.reciprocal(l_ref[...] + EPS, approx=True)                 # [b_pad, 1] (EUP)
    m_cand = jnp.sum(mask_f * m_ref[...], axis=0, keepdims=True)       # [1, tn]
    inv_cand = jnp.sum(mask_f * inv, axis=0, keepdims=True)            # [1, tn]
    probs_ref[...] = jnp.exp(logits_ref[...] - m_cand) * inv_cand


def prepare_actor_params(params):
    """One-time cast/reshape of weights into kernel dtypes (hoisted off hot path)."""
    bf16, f32 = jnp.bfloat16, jnp.float32
    dk = params["q_final_w"].shape[1]
    weights = []
    for (wq, bq), (wk, bk) in zip(params["q_layers"], params["k_layers"]):
        weights += [wq.astype(bf16), bq.astype(f32),
                    wk.astype(bf16), bk.astype(f32)]
    weights += [params["q_final_w"].astype(bf16), params["q_final_b"].astype(f32),
                params["k_final_w"].astype(bf16), params["k_final_b"].astype(f32),
                params["f1_wq"].astype(bf16), params["f1_wk"].astype(bf16),
                params["f1_b"].astype(f32),
                params["f2_w"].reshape(1, dk).astype(bf16),
                params["f2_b"].reshape(1, 1).astype(f32)]
    return {"num_layers": len(params["q_layers"]), "dk": dk,
            "weights": tuple(jax.device_put(w) for w in weights)}


def gapn_actor_probs(q_emb, k_emb, batch_idx, prep, tile_n=2048):
    """Hot path (MLPs, one-hot expansion, segment softmax) as two Pallas calls."""
    B, D = q_emb.shape
    N = k_emb.shape[0]
    L = prep["num_layers"]
    dk = prep["dk"]
    weights = prep["weights"]

    tn = min(tile_n, _round_up(N, 128))        # lane-dense tile, multiple of 128
    n_tiles = -(-N // tn)
    n_split = 2 if n_tiles >= 2 else 1         # 2-way split of pass 1 (v7x 2 TC)
    n_half = -(-n_tiles // n_split)
    n_pad = n_split * n_half * tn
    b_pad = _round_up(B + 1, 8)                # +1 dummy graph slot for padding
    grid = (n_split, n_half)

    batch = jnp.asarray(batch_idx, jnp.int32)
    batch_row = jnp.pad(batch, (0, n_pad - N), constant_values=B).reshape(1, n_pad)

    q_p = jnp.pad(q_emb.astype(jnp.bfloat16), ((0, b_pad - B), (0, 0)))
    k_p = jnp.pad(k_emb.astype(jnp.bfloat16), ((0, n_pad - N), (0, 0)))

    inputs = [batch_row, q_p, k_p] + list(weights)

    def tile(c, i, nh=n_half):
        return c * nh + i

    in_specs = [pl.BlockSpec((1, tn), lambda c, i: (0, tile(c, i))),
                pl.BlockSpec((b_pad, D), lambda c, i: (0, 0)),
                pl.BlockSpec((tn, D), lambda c, i: (tile(c, i), 0))]
    in_specs += [pl.BlockSpec(w.shape, lambda c, i: (0, 0)) for w in weights]

    logits, m_parts, l_parts = pl.pallas_call(
        functools.partial(_pass1_kernel, L, b_pad),
        grid=grid,
        in_specs=in_specs,
        out_specs=(pl.BlockSpec((1, tn), lambda c, i: (0, tile(c, i))),
                   pl.BlockSpec((None, b_pad, 1), lambda c, i: (c, 0, 0)),
                   pl.BlockSpec((None, b_pad, 1), lambda c, i: (c, 0, 0))),
        out_shape=(jax.ShapeDtypeStruct((1, n_pad), jnp.float32),
                   jax.ShapeDtypeStruct((n_split, b_pad, 1), jnp.float32),
                   jax.ShapeDtypeStruct((n_split, b_pad, 1), jnp.float32)),
        scratch_shapes=[pltpu.VMEM((b_pad, dk), jnp.bfloat16)],
        compiler_params=pltpu.CompilerParams(
            dimension_semantics=("parallel", "arbitrary"),
            vmem_limit_bytes=_VMEM_LIMIT),
    )(*inputs)

    # Merge the per-split online-softmax partials (cheap log-sum-exp combine).
    m = jnp.max(m_parts, axis=0)                                  # [b_pad, 1]
    l = jnp.sum(l_parts * jnp.exp(m_parts - m[None]), axis=0)     # [b_pad, 1]

    probs_row = pl.pallas_call(
        functools.partial(_pass2_kernel, b_pad),
        grid=(n_pad // tn,),
        in_specs=[pl.BlockSpec((1, tn), lambda i: (0, i)),
                  pl.BlockSpec((1, tn), lambda i: (0, i)),
                  pl.BlockSpec((b_pad, 1), lambda i: (0, 0)),
                  pl.BlockSpec((b_pad, 1), lambda i: (0, 0))],
        out_specs=pl.BlockSpec((1, tn), lambda i: (0, i)),
        out_shape=jax.ShapeDtypeStruct((1, n_pad), jnp.float32),
        compiler_params=pltpu.CompilerParams(
            dimension_semantics=("parallel",),
            vmem_limit_bytes=_VMEM_LIMIT),
    )(batch_row, logits, m, l)

    return probs_row[0, :N]


def gapn_actor_forward(q_emb, k_emb, batch_idx, prep, sample_key):
    """Full forward: probs (kernels) + categorical sample / logprob (segment glue)."""
    num_graphs = q_emb.shape[0]
    N = k_emb.shape[0]
    probs = gapn_actor_probs(q_emb, k_emb, batch_idx, prep)            # [N]

    # batched_sample: Categorical(p * (p > EPS)) per graph via flat Gumbel-max
    # segment ops (no dense [B, N] materialization).
    p = probs * (probs > EPS).astype(probs.dtype)
    g = jax.random.gumbel(sample_key, probs.shape, probs.dtype)
    scores = jnp.where(p > 0, jnp.log(jnp.maximum(p, 1e-30)) + g, -jnp.inf)
    seg_max = jax.ops.segment_max(scores, batch_idx, num_segments=num_graphs)
    is_best = scores >= seg_max[batch_idx]
    cand_idx = jnp.where(is_best, jnp.arange(N, dtype=jnp.int32), N)
    shifted_actions = jax.ops.segment_min(cand_idx, batch_idx,
                                          num_segments=num_graphs)     # [B]

    counts = jnp.bincount(batch_idx, length=num_graphs)
    batch_shift = jnp.cumsum(counts) - counts                          # [B]
    actions = shifted_actions - batch_shift
    action_logprobs = jnp.log(probs[shifted_actions])
    return probs, action_logprobs, actions


def init_params(key, input_dim, enc_nb_layers, enc_nb_hidden, enc_nb_output):
    """Deterministic synthetic parameter init (weights stored [in, out])."""
    def nxt():
        nonlocal key
        key, sub = jax.random.split(key)
        return sub

    params = {"q_layers": [], "k_layers": []}
    in_dim = input_dim
    for _ in range(enc_nb_layers):
        params["q_layers"].append(
            (0.1 * jax.random.normal(nxt(), (in_dim, enc_nb_hidden), jnp.float32),
             0.1 * jax.random.normal(nxt(), (1, enc_nb_hidden), jnp.float32)))
        params["k_layers"].append(
            (0.1 * jax.random.normal(nxt(), (in_dim, enc_nb_hidden), jnp.float32),
             0.1 * jax.random.normal(nxt(), (1, enc_nb_hidden), jnp.float32)))
        in_dim = enc_nb_hidden
    params["q_final_w"] = 0.1 * jax.random.normal(nxt(), (in_dim, enc_nb_output), jnp.float32)
    params["q_final_b"] = 0.1 * jax.random.normal(nxt(), (1, enc_nb_output), jnp.float32)
    params["k_final_w"] = 0.1 * jax.random.normal(nxt(), (in_dim, enc_nb_output), jnp.float32)
    params["k_final_b"] = 0.1 * jax.random.normal(nxt(), (1, enc_nb_output), jnp.float32)
    # final_layers[0]: Linear(2*enc_nb_output -> enc_nb_output), split into Q/K halves
    params["f1_wq"] = 0.1 * jax.random.normal(nxt(), (enc_nb_output, enc_nb_output), jnp.float32)
    params["f1_wk"] = 0.1 * jax.random.normal(nxt(), (enc_nb_output, enc_nb_output), jnp.float32)
    params["f1_b"] = 0.1 * jax.random.normal(nxt(), (1, enc_nb_output), jnp.float32)
    # final_layers[1]: Linear(enc_nb_output -> 1)
    params["f2_w"] = 0.1 * jax.random.normal(nxt(), (enc_nb_output, 1), jnp.float32)
    params["f2_b"] = 0.1 * jax.random.normal(nxt(), (1, 1), jnp.float32)
    return params


if __name__ == "__main__":
    key = jax.random.PRNGKey(0)
    k_q, k_k, k_par, k_samp = jax.random.split(key, 4)

    # Small shapes: 2 graphs, 16 candidate nodes total, embedding dim 32.
    num_graphs, num_cands = 2, 16
    input_dim, enc_nb_layers, enc_nb_hidden, enc_nb_output = 32, 2, 32, 32

    batch_idx = jnp.array([0] * 6 + [1] * 10, dtype=jnp.int32)         # sorted groups
    q_emb = jax.random.normal(k_q, (num_graphs, input_dim), jnp.float32)   # GNN(g)
    k_emb = jax.random.normal(k_k, (num_cands, input_dim), jnp.float32)    # GNN(g_candidates)

    params = init_params(k_par, input_dim, enc_nb_layers, enc_nb_hidden, enc_nb_output)
    prep = prepare_actor_params(params)        # one-time kernel-dtype cast (hoisted)

    probs, action_logprobs, actions = gapn_actor_forward(
        q_emb, k_emb, batch_idx, prep, k_samp)
    jax.block_until_ready((probs, action_logprobs, actions))

    assert probs.shape == (num_cands,)
    assert action_logprobs.shape == (num_graphs,)
    assert actions.shape == (num_graphs,)
    assert bool(jnp.all(jnp.isfinite(probs)))
    print("KERNEL_OK")
</pallas_src>

<mosaic_0001>
module attributes {stable_mosaic.version = 11 : i64} {
  func.func @_pass1_kernel(%arg0: i32, %arg1: i32, %arg2: memref<1x128xi32, #tpu.memory_space<vmem>>, %arg3: memref<8x32xbf16, #tpu.memory_space<vmem>>, %arg4: memref<128x32xbf16, #tpu.memory_space<vmem>>, %arg5: memref<32x32xbf16, #tpu.memory_space<vmem>>, %arg6: memref<1x32xf32, #tpu.memory_space<vmem>>, %arg7: memref<32x32xbf16, #tpu.memory_space<vmem>>, %arg8: memref<1x32xf32, #tpu.memory_space<vmem>>, %arg9: memref<32x32xbf16, #tpu.memory_space<vmem>>, %arg10: memref<1x32xf32, #tpu.memory_space<vmem>>, %arg11: memref<32x32xbf16, #tpu.memory_space<vmem>>, %arg12: memref<1x32xf32, #tpu.memory_space<vmem>>, %arg13: memref<32x32xbf16, #tpu.memory_space<vmem>>, %arg14: memref<1x32xf32, #tpu.memory_space<vmem>>, %arg15: memref<32x32xbf16, #tpu.memory_space<vmem>>, %arg16: memref<1x32xf32, #tpu.memory_space<vmem>>, %arg17: memref<32x32xbf16, #tpu.memory_space<vmem>>, %arg18: memref<32x32xbf16, #tpu.memory_space<vmem>>, %arg19: memref<1x32xf32, #tpu.memory_space<vmem>>, %arg20: memref<1x32xbf16, #tpu.memory_space<vmem>>, %arg21: memref<1x1xf32, #tpu.memory_space<vmem>>, %arg22: memref<1x128xf32, #tpu.memory_space<vmem>>, %arg23: memref<1x8x1xf32, #tpu.memory_space<vmem>>, %arg24: memref<1x8x1xf32, #tpu.memory_space<vmem>>, %arg25: memref<8x32xbf16, #tpu.memory_space<vmem>>) attributes {dimension_semantics = [#tpu.dimension_semantics<parallel>, #tpu.dimension_semantics<arbitrary>], iteration_bounds = array<i64: 1, 1>, scalar_prefetch = 0 : i64, scratch_operands = 1 : i64, tpu.core_type = #tpu.core_type<tc>, window_params = [{transform_indices = @transform_0, window_bounds = array<i64: 1, 128>}, {pipeline_mode = #tpu.pipeline_mode<synchronous>, transform_indices = @transform_1, window_bounds = array<i64: 8, 32>}, {transform_indices = @transform_2, window_bounds = array<i64: 128, 32>}, {pipeline_mode = #tpu.pipeline_mode<synchronous>, transform_indices = @transform_3, window_bounds = array<i64: 32, 32>}, {pipeline_mode = #tpu.pipeline_mode<synchronous>, transform_indices = @transform_4, window_bounds = array<i64: 1, 32>}, {pipeline_mode = #tpu.pipeline_mode<synchronous>, transform_indices = @transform_5, window_bounds = array<i64: 32, 32>}, {pipeline_mode = #tpu.pipeline_mode<synchronous>, transform_indices = @transform_6, window_bounds = array<i64: 1, 32>}, {pipeline_mode = #tpu.pipeline_mode<synchronous>, transform_indices = @transform_7, window_bounds = array<i64: 32, 32>}, {pipeline_mode = #tpu.pipeline_mode<synchronous>, transform_indices = @transform_8, window_bounds = array<i64: 1, 32>}, {pipeline_mode = #tpu.pipeline_mode<synchronous>, transform_indices = @transform_9, window_bounds = array<i64: 32, 32>}, {pipeline_mode = #tpu.pipeline_mode<synchronous>, transform_indices = @transform_10, window_bounds = array<i64: 1, 32>}, {pipeline_mode = #tpu.pipeline_mode<synchronous>, transform_indices = @transform_11, window_bounds = array<i64: 32, 32>}, {pipeline_mode = #tpu.pipeline_mode<synchronous>, transform_indices = @transform_12, window_bounds = array<i64: 1, 32>}, {pipeline_mode = #tpu.pipeline_mode<synchronous>, transform_indices = @transform_13, window_bounds = array<i64: 32, 32>}, {pipeline_mode = #tpu.pipeline_mode<synchronous>, transform_indices = @transform_14, window_bounds = array<i64: 1, 32>}, {pipeline_mode = #tpu.pipeline_mode<synchronous>, transform_indices = @transform_15, window_bounds = array<i64: 32, 32>}, {pipeline_mode = #tpu.pipeline_mode<synchronous>, transform_indices = @transform_16, window_bounds = array<i64: 32, 32>}, {pipeline_mode = #tpu.pipeline_mode<synchronous>, transform_indices = @transform_17, window_bounds = array<i64: 1, 32>}, {pipeline_mode = #tpu.pipeline_mode<synchronous>, transform_indices = @transform_18, window_bounds = array<i64: 1, 32>}, {pipeline_mode = #tpu.pipeline_mode<synchronous>, transform_indices = @transform_19, window_bounds = array<i64: 1, 1>}, {transform_indices = @transform_20, window_bounds = array<i64: 1, 128>}, {transform_indices = @transform_21, window_bounds = array<i64: 1, 8, 1>}, {transform_indices = @transform_22, window_bounds = array<i64: 1, 8, 1>}]} {
    %c0_i32 = arith.constant 0 : i32
    %0 = arith.cmpi eq, %arg1, %c0_i32 : i32
    %1 = arith.extui %0 : i1 to i32
    %c0_i32_0 = arith.constant 0 : i32
    %2 = arith.cmpi ne, %1, %c0_i32_0 : i32
    scf.if %2 {
      %cst_53 = arith.constant -1.000000e+30 : f32
      %85 = vector.broadcast %cst_53 : f32 to vector<8x1xf32>
      %c0_54 = arith.constant 0 : index
      %c0_55 = arith.constant 0 : index
      %c0_56 = arith.constant 0 : index
      %86 = vector.load %arg23[%c0_54, %c0_55, %c0_56] : memref<1x8x1xf32, #tpu.memory_space<vmem>>, vector<1x8x1xf32>
      %87 = vector.shape_cast %86 : vector<1x8x1xf32> to vector<8x1xf32>
      %88 = vector.shape_cast %85 : vector<8x1xf32> to vector<1x8x1xf32>
      tpu.vector_store %arg23[%c0_54, %c0_55, %c0_56], %88 {strides = array<i32>} : memref<1x8x1xf32, #tpu.memory_space<vmem>>, vector<1x8x1xf32>,
      %cst_57 = arith.constant 0.000000e+00 : f32
      %89 = vector.broadcast %cst_57 : f32 to vector<8x1xf32>
      %c0_58 = arith.constant 0 : index
      %c0_59 = arith.constant 0 : index
      %c0_60 = arith.constant 0 : index
      %90 = vector.load %arg24[%c0_58, %c0_59, %c0_60] : memref<1x8x1xf32, #tpu.memory_space<vmem>>, vector<1x8x1xf32>
      %91 = vector.shape_cast %90 : vector<1x8x1xf32> to vector<8x1xf32>
      %92 = vector.shape_cast %89 : vector<8x1xf32> to vector<1x8x1xf32>
      tpu.vector_store %arg24[%c0_58, %c0_59, %c0_60], %92 {strides = array<i32>} : memref<1x8x1xf32, #tpu.memory_space<vmem>>, vector<1x8x1xf32>,
      %c0_61 = arith.constant 0 : index
      %c0_62 = arith.constant 0 : index
      %93 = vector.load %arg3[%c0_61, %c0_62] : memref<8x32xbf16, #tpu.memory_space<vmem>>, vector<8x32xbf16>
      %c0_63 = arith.constant 0 : index
      %c0_64 = arith.constant 0 : index
      %94 = vector.load %arg5[%c0_63, %c0_64] : memref<32x32xbf16, #tpu.memory_space<vmem>>, vector<32x32xbf16>
      %cst_65 = arith.constant dense<0.000000e+00> : vector<8x32xf32>
      %95 = tpu.matmul %93, %94, %cst_65 {dimension_numbers = #tpu.dot_dimension_numbers<[1], [0], [0], [1], [0, 0, 1, 1], [], []>} : vector<8x32xbf16>, vector<32x32xbf16>, vector<8x32xf32> -> vector<8x32xf32>
      %c0_66 = arith.constant 0 : index
      %c0_67 = arith.constant 0 : index
      %96 = vector.load %arg6[%c0_66, %c0_67] : memref<1x32xf32, #tpu.memory_space<vmem>>, vector<1x32xf32>
      %97 = vector.broadcast %96 : vector<1x32xf32> to vector<8x32xf32>
      %98 = arith.addf %95, %97 : vector<8x32xf32>
      %cst_68 = arith.constant 0.000000e+00 : f32
      %99 = vector.broadcast %cst_68 : f32 to vector<8x32xf32>
      %100 = arith.maximumf %98, %99 : vector<8x32xf32>
      %101 = arith.truncf %100 : vector<8x32xf32> to vector<8x32xbf16>
      %c0_69 = arith.constant 0 : index
      %c0_70 = arith.constant 0 : index
      %102 = vector.load %arg9[%c0_69, %c0_70] : memref<32x32xbf16, #tpu.memory_space<vmem>>, vector<32x32xbf16>
      %cst_71 = arith.constant dense<0.000000e+00> : vector<8x32xf32>
      %103 = tpu.matmul %101, %102, %cst_71 {dimension_numbers = #tpu.dot_dimension_numbers<[1], [0], [0], [1], [0, 0, 1, 1], [], []>} : vector<8x32xbf16>, vector<32x32xbf16>, vector<8x32xf32> -> vector<8x32xf32>
      %c0_72 = arith.constant 0 : index
      %c0_73 = arith.constant 0 : index
      %104 = vector.load %arg10[%c0_72, %c0_73] : memref<1x32xf32, #tpu.memory_space<vmem>>, vector<1x32xf32>
      %105 = vector.broadcast %104 : vector<1x32xf32> to vector<8x32xf32>
      %106 = arith.addf %103, %105 : vector<8x32xf32>
      %cst_74 = arith.constant 0.000000e+00 : f32
      %107 = vector.broadcast %cst_74 : f32 to vector<8x32xf32>
      %108 = arith.maximumf %106, %107 : vector<8x32xf32>
      %109 = arith.truncf %108 : vector<8x32xf32> to vector<8x32xbf16>
      %c0_75 = arith.constant 0 : index
      %c0_76 = arith.constant 0 : index
      %110 = vector.load %arg13[%c0_75, %c0_76] : memref<32x32xbf16, #tpu.memory_space<vmem>>, vector<32x32xbf16>
      %cst_77 = arith.constant dense<0.000000e+00> : vector<8x32xf32>
      %111 = tpu.matmul %109, %110, %cst_77 {dimension_numbers = #tpu.dot_dimension_numbers<[1], [0], [0], [1], [0, 0, 1, 1], [], []>} : vector<8x32xbf16>, vector<32x32xbf16>, vector<8x32xf32> -> vector<8x32xf32>
      %c0_78 = arith.constant 0 : index
      %c0_79 = arith.constant 0 : index
      %112 = vector.load %arg14[%c0_78, %c0_79] : memref<1x32xf32, #tpu.memory_space<vmem>>, vector<1x32xf32>
      %113 = vector.broadcast %112 : vector<1x32xf32> to vector<8x32xf32>
      %114 = arith.addf %111, %113 : vector<8x32xf32>
      %cst_80 = arith.constant 0.000000e+00 : f32
      %115 = vector.broadcast %cst_80 : f32 to vector<8x32xf32>
      %116 = arith.maximumf %114, %115 : vector<8x32xf32>
      %117 = arith.truncf %116 : vector<8x32xf32> to vector<8x32xbf16>
      %c0_81 = arith.constant 0 : index
      %c0_82 = arith.constant 0 : index
      %118 = vector.load %arg17[%c0_81, %c0_82] : memref<32x32xbf16, #tpu.memory_space<vmem>>, vector<32x32xbf16>
      %cst_83 = arith.constant dense<0.000000e+00> : vector<8x32xf32>
      %119 = tpu.matmul %117, %118, %cst_83 {dimension_numbers = #tpu.dot_dimension_numbers<[1], [0], [0], [1], [0, 0, 1, 1], [], []>} : vector<8x32xbf16>, vector<32x32xbf16>, vector<8x32xf32> -> vector<8x32xf32>
      %120 = arith.truncf %119 : vector<8x32xf32> to vector<8x32xbf16>
      %c0_84 = arith.constant 0 : index
      %c0_85 = arith.constant 0 : index
      %121 = vector.load %arg25[%c0_84, %c0_85] : memref<8x32xbf16, #tpu.memory_space<vmem>>, vector<8x32xbf16>
      tpu.vector_store %arg25[%c0_84, %c0_85], %120 {strides = array<i32>} : memref<8x32xbf16, #tpu.memory_space<vmem>>, vector<8x32xbf16>,
    } else {
    }
    %c0 = arith.constant 0 : index
    %c0_1 = arith.constant 0 : index
    %3 = vector.load %arg4[%c0, %c0_1] : memref<128x32xbf16, #tpu.memory_space<vmem>>, vector<128x32xbf16>
    %c0_2 = arith.constant 0 : index
    %c0_3 = arith.constant 0 : index
    %4 = vector.load %arg7[%c0_2, %c0_3] : memref<32x32xbf16, #tpu.memory_space<vmem>>, vector<32x32xbf16>
    %cst = arith.constant dense<0.000000e+00> : vector<128x32xf32>
    %5 = tpu.matmul %3, %4, %cst {dimension_numbers = #tpu.dot_dimension_numbers<[1], [0], [0], [1], [0, 0, 1, 1], [], []>} : vector<128x32xbf16>, vector<32x32xbf16>, vector<128x32xf32> -> vector<128x32xf32>
    %c0_4 = arith.constant 0 : index
    %c0_5 = arith.constant 0 : index
    %6 = vector.load %arg8[%c0_4, %c0_5] : memref<1x32xf32, #tpu.memory_space<vmem>>, vector<1x32xf32>
    %7 = vector.broadcast %6 : vector<1x32xf32> to vector<128x32xf32>
    %8 = arith.addf %5, %7 : vector<128x32xf32>
    %cst_6 = arith.constant 0.000000e+00 : f32
    %9 = vector.broadcast %cst_6 : f32 to vector<128x32xf32>
    %10 = arith.maximumf %8, %9 : vector<128x32xf32>
    %11 = arith.truncf %10 : vector<128x32xf32> to vector<128x32xbf16>
    %c0_7 = arith.constant 0 : index
    %c0_8 = arith.constant 0 : index
    %12 = vector.load %arg11[%c0_7, %c0_8] : memref<32x32xbf16, #tpu.memory_space<vmem>>, vector<32x32xbf16>
    %cst_9 = arith.constant dense<0.000000e+00> : vector<128x32xf32>
    %13 = tpu.matmul %11, %12, %cst_9 {dimension_numbers = #tpu.dot_dimension_numbers<[1], [0], [0], [1], [0, 0, 1, 1], [], []>} : vector<128x32xbf16>, vector<32x32xbf16>, vector<128x32xf32> -> vector<128x32xf32>
    %c0_10 = arith.constant 0 : index
    %c0_11 = arith.constant 0 : index
    %14 = vector.load %arg12[%c0_10, %c0_11] : memref<1x32xf32, #tpu.memory_space<vmem>>, vector<1x32xf32>
    %15 = vector.broadcast %14 : vector<1x32xf32> to vector<128x32xf32>
    %16 = arith.addf %13, %15 : vector<128x32xf32>
    %cst_12 = arith.constant 0.000000e+00 : f32
    %17 = vector.broadcast %cst_12 : f32 to vector<128x32xf32>
    %18 = arith.maximumf %16, %17 : vector<128x32xf32>
    %19 = arith.truncf %18 : vector<128x32xf32> to vector<128x32xbf16>
    %c0_13 = arith.constant 0 : index
    %c0_14 = arith.constant 0 : index
    %20 = vector.load %arg15[%c0_13, %c0_14] : memref<32x32xbf16, #tpu.memory_space<vmem>>, vector<32x32xbf16>
    %cst_15 = arith.constant dense<0.000000e+00> : vector<128x32xf32>
    %21 = tpu.matmul %19, %20, %cst_15 {dimension_numbers = #tpu.dot_dimension_numbers<[1], [0], [0], [1], [0, 0, 1, 1], [], []>} : vector<128x32xbf16>, vector<32x32xbf16>, vector<128x32xf32> -> vector<128x32xf32>
    %c0_16 = arith.constant 0 : index
    %c0_17 = arith.constant 0 : index
    %22 = vector.load %arg16[%c0_16, %c0_17] : memref<1x32xf32, #tpu.memory_space<vmem>>, vector<1x32xf32>
    %23 = vector.broadcast %22 : vector<1x32xf32> to vector<128x32xf32>
    %24 = arith.addf %21, %23 : vector<128x32xf32>
    %c0_18 = arith.constant 0 : index
    %c0_19 = arith.constant 0 : index
    %25 = vector.load %arg2[%c0_18, %c0_19] : memref<1x128xi32, #tpu.memory_space<vmem>>, vector<1x128xi32>
    %26 = tpu.iota {dimensions = array<i32: 0>} : vector<8x128xi32>
    %27 = vector.broadcast %25 : vector<1x128xi32> to vector<8x128xi32>
    %28 = arith.cmpi eq, %26, %27 : vector<8x128xi32>
    %29 = arith.extui %28 : vector<8x128xi1> to vector<8x128xi32>
    %30 = arith.sitofp %29 : vector<8x128xi32> to vector<8x128xf32>
    %31 = arith.extui %28 : vector<8x128xi1> to vector<8x128xi32>
    %32 = arith.sitofp %31 : vector<8x128xi32> to vector<8x128xf32>
    %33 = arith.truncf %32 : vector<8x128xf32> to vector<8x128xbf16>
    %c0_20 = arith.constant 0 : index
    %c0_21 = arith.constant 0 : index
    %34 = vector.load %arg25[%c0_20, %c0_21] : memref<8x32xbf16, #tpu.memory_space<vmem>>, vector<8x32xbf16>
    %cst_22 = arith.constant dense<0.000000e+00> : vector<128x32xf32>
    %35 = tpu.matmul %33, %34, %cst_22 {dimension_numbers = #tpu.dot_dimension_numbers<[0], [0], [1], [1], [0, 1, 1, 1], [], []>} : vector<8x128xbf16>, vector<8x32xbf16>, vector<128x32xf32> -> vector<128x32xf32>
    %cst_23 = arith.constant 0.000000e+00 : f32
    %36 = vector.broadcast %cst_23 : f32 to vector<128x32xf32>
    %37 = arith.maximumf %24, %36 : vector<128x32xf32>
    %38 = arith.truncf %37 : vector<128x32xf32> to vector<128x32xbf16>
    %c0_24 = arith.constant 0 : index
    %c0_25 = arith.constant 0 : index
    %39 = vector.load %arg18[%c0_24, %c0_25] : memref<32x32xbf16, #tpu.memory_space<vmem>>, vector<32x32xbf16>
    %cst_26 = arith.constant dense<0.000000e+00> : vector<128x32xf32>
    %40 = tpu.matmul %38, %39, %cst_26 {dimension_numbers = #tpu.dot_dimension_numbers<[1], [0], [0], [1], [0, 0, 1, 1], [], []>} : vector<128x32xbf16>, vector<32x32xbf16>, vector<128x32xf32> -> vector<128x32xf32>
    %41 = arith.addf %35, %40 : vector<128x32xf32>
    %c0_27 = arith.constant 0 : index
    %c0_28 = arith.constant 0 : index
    %42 = vector.load %arg19[%c0_27, %c0_28] : memref<1x32xf32, #tpu.memory_space<vmem>>, vector<1x32xf32>
    %43 = vector.broadcast %42 : vector<1x32xf32> to vector<128x32xf32>
    %44 = arith.addf %41, %43 : vector<128x32xf32>
    %cst_29 = arith.constant 0.000000e+00 : f32
    %45 = vector.broadcast %cst_29 : f32 to vector<128x32xf32>
    %46 = arith.maximumf %44, %45 : vector<128x32xf32>
    %47 = arith.truncf %46 : vector<128x32xf32> to vector<128x32xbf16>
    %c0_30 = arith.constant 0 : index
    %c0_31 = arith.constant 0 : index
    %48 = vector.load %arg20[%c0_30, %c0_31] : memref<1x32xbf16, #tpu.memory_space<vmem>>, vector<1x32xbf16>
    %cst_32 = arith.constant dense<0.000000e+00> : vector<1x128xf32>
    %49 = tpu.matmul %48, %47, %cst_32 {dimension_numbers = #tpu.dot_dimension_numbers<[1], [1], [0], [0], [0, 0, 1, 0], [], []>} : vector<1x32xbf16>, vector<128x32xbf16>, vector<1x128xf32> -> vector<1x128xf32>
    %c0_33 = arith.constant 0 : index
    %c0_34 = arith.constant 0 : index
    %50 = vector.load %arg21[%c0_33, %c0_34] : memref<1x1xf32, #tpu.memory_space<vmem>>, vector<1x1xf32>
    %51 = vector.broadcast %50 : vector<1x1xf32> to vector<1x128xf32>
    %52 = arith.addf %49, %51 : vector<1x128xf32>
    %c0_35 = arith.constant 0 : index
    %c0_36 = arith.constant 0 : index
    %53 = vector.load %arg22[%c0_35, %c0_36] : memref<1x128xf32, #tpu.memory_space<vmem>>, vector<1x128xf32>
    tpu.vector_store %arg22[%c0_35, %c0_36], %52 {strides = array<i32>} : memref<1x128xf32, #tpu.memory_space<vmem>>, vector<1x128xf32>,
    %cst_37 = arith.constant -1.000000e+30 : f32
    %54 = vector.shape_cast %52 : vector<1x128xf32> to vector<1x128xf32>
    %55 = vector.broadcast %54 : vector<1x128xf32> to vector<8x128xf32>
    %56 = vector.broadcast %cst_37 : f32 to vector<8x128xf32>
    %57 = arith.select %28, %55, %56 : vector<8x128xi1>, vector<8x128xf32>
    %cst_38 = arith.constant dense<0xFF800000> : vector<8xf32>
    %58 = vector.multi_reduction <maximumf>, %57, %cst_38 [1] : vector<8x128xf32> to vector<8xf32>
    %59 = vector.shape_cast %58 : vector<8xf32> to vector<8x1xf32>
    %c0_39 = arith.constant 0 : index
    %c0_40 = arith.constant 0 : index
    %c0_41 = arith.constant 0 : index
    %60 = vector.load %arg23[%c0_39, %c0_40, %c0_41] : memref<1x8x1xf32, #tpu.memory_space<vmem>>, vector<1x8x1xf32>
    %61 = vector.shape_cast %60 : vector<1x8x1xf32> to vector<8x1xf32>
    %62 = arith.maximumf %61, %59 : vector<8x1xf32>
    %63 = vector.broadcast %62 : vector<8x1xf32> to vector<8x128xf32>
    %64 = arith.mulf %30, %63 : vector<8x128xf32>
    %cst_42 = arith.constant dense<0.000000e+00> : vector<128xf32>
    %65 = vector.multi_reduction <add>, %64, %cst_42 [0] : vector<8x128xf32> to vector<128xf32>
    %66 = vector.shape_cast %65 : vector<128xf32> to vector<1x128xf32>
    %67 = arith.subf %52, %66 : vector<1x128xf32>
    %68 = math.exp %67 : vector<1x128xf32>
    %69 = vector.broadcast %68 : vector<1x128xf32> to vector<8x128xf32>
    %70 = arith.mulf %30, %69 : vector<8x128xf32>
    %cst_43 = arith.constant dense<0.000000e+00> : vector<8xf32>
    %71 = vector.multi_reduction <add>, %70, %cst_43 [1] : vector<8x128xf32> to vector<8xf32>
    %72 = vector.shape_cast %71 : vector<8xf32> to vector<8x1xf32>
    %c0_44 = arith.constant 0 : index
    %c0_45 = arith.constant 0 : index
    %c0_46 = arith.constant 0 : index
    %73 = vector.load %arg24[%c0_44, %c0_45, %c0_46] : memref<1x8x1xf32, #tpu.memory_space<vmem>>, vector<1x8x1xf32>
    %74 = vector.shape_cast %73 : vector<1x8x1xf32> to vector<8x1xf32>
    %75 = arith.subf %61, %62 : vector<8x1xf32>
    %76 = math.exp %75 : vector<8x1xf32>
    %77 = arith.mulf %74, %76 : vector<8x1xf32>
    %78 = arith.addf %77, %72 : vector<8x1xf32>
    %c0_47 = arith.constant 0 : index
    %c0_48 = arith.constant 0 : index
    %c0_49 = arith.constant 0 : index
    %79 = vector.load %arg24[%c0_47, %c0_48, %c0_49] : memref<1x8x1xf32, #tpu.memory_space<vmem>>, vector<1x8x1xf32>
    %80 = vector.shape_cast %79 : vector<1x8x1xf32> to vector<8x1xf32>
    %81 = vector.shape_cast %78 : vector<8x1xf32> to vector<1x8x1xf32>
    tpu.vector_store %arg24[%c0_47, %c0_48, %c0_49], %81 {strides = array<i32>} : memref<1x8x1xf32, #tpu.memory_space<vmem>>, vector<1x8x1xf32>,
    %c0_50 = arith.constant 0 : index
    %c0_51 = arith.constant 0 : index
    %c0_52 = arith.constant 0 : index
    %82 = vector.load %arg23[%c0_50, %c0_51, %c0_52] : memref<1x8x1xf32, #tpu.memory_space<vmem>>, vector<1x8x1xf32>
    %83 = vector.shape_cast %82 : vector<1x8x1xf32> to vector<8x1xf32>
    %84 = vector.shape_cast %62 : vector<8x1xf32> to vector<1x8x1xf32>
    tpu.vector_store %arg23[%c0_50, %c0_51, %c0_52], %84 {strides = array<i32>} : memref<1x8x1xf32, #tpu.memory_space<vmem>>, vector<1x8x1xf32>,
    return
  }
  func.func @transform_0(%arg0: i32, %arg1: i32) -> (i32, i32) {
    %c1_i32 = arith.constant 1 : i32
    %0 = arith.muli %arg0, %c1_i32 : i32
    %1 = arith.addi %0, %arg1 : i32
    %c0_i32 = arith.constant 0 : i32
    %c0_i32_0 = arith.constant 0 : i32
    return %c0_i32, %1 : i32, i32
  }
  func.func @transform_1(%arg0: i32, %arg1: i32) -> (i32, i32) {
    %c0_i32 = arith.constant 0 : i32
    %c0_i32_0 = arith.constant 0 : i32
    %c0_i32_1 = arith.constant 0 : i32
    return %c0_i32, %c0_i32_0 : i32, i32
  }
  func.func @transform_2(%arg0: i32, %arg1: i32) -> (i32, i32) {
    %c1_i32 = arith.constant 1 : i32
    %0 = arith.muli %arg0, %c1_i32 : i32
    %1 = arith.addi %0, %arg1 : i32
    %c0_i32 = arith.constant 0 : i32
    %c0_i32_0 = arith.constant 0 : i32
    return %1, %c0_i32 : i32, i32
  }
  func.func @transform_3(%arg0: i32, %arg1: i32) -> (i32, i32) {
    %c0_i32 = arith.constant 0 : i32
    %c0_i32_0 = arith.constant 0 : i32
    %c0_i32_1 = arith.constant 0 : i32
    return %c0_i32, %c0_i32_0 : i32, i32
  }
  func.func @transform_4(%arg0: i32, %arg1: i32) -> (i32, i32) {
    %c0_i32 = arith.constant 0 : i32
    %c0_i32_0 = arith.constant 0 : i32
    %c0_i32_1 = arith.constant 0 : i32
    return %c0_i32, %c0_i32_0 : i32, i32
  }
  func.func @transform_5(%arg0: i32, %arg1: i32) -> (i32, i32) {
    %c0_i32 = arith.constant 0 : i32
    %c0_i32_0 = arith.constant 0 : i32
    %c0_i32_1 = arith.constant 0 : i32
    return %c0_i32, %c0_i32_0 : i32, i32
  }
  func.func @transform_6(%arg0: i32, %arg1: i32) -> (i32, i32) {
    %c0_i32 = arith.constant 0 : i32
    %c0_i32_0 = arith.constant 0 : i32
    %c0_i32_1 = arith.constant 0 : i32
    return %c0_i32, %c0_i32_0 : i32, i32
  }
  func.func @transform_7(%arg0: i32, %arg1: i32) -> (i32, i32) {
    %c0_i32 = arith.constant 0 : i32
    %c0_i32_0 = arith.constant 0 : i32
    %c0_i32_1 = arith.constant 0 : i32
    return %c0_i32, %c0_i32_0 : i32, i32
  }
  func.func @transform_8(%arg0: i32, %arg1: i32) -> (i32, i32) {
    %c0_i32 = arith.constant 0 : i32
    %c0_i32_0 = arith.constant 0 : i32
    %c0_i32_1 = arith.constant 0 : i32
    return %c0_i32, %c0_i32_0 : i32, i32
  }
  func.func @transform_9(%arg0: i32, %arg1: i32) -> (i32, i32) {
    %c0_i32 = arith.constant 0 : i32
    %c0_i32_0 = arith.constant 0 : i32
    %c0_i32_1 = arith.constant 0 : i32
    return %c0_i32, %c0_i32_0 : i32, i32
  }
  func.func @transform_10(%arg0: i32, %arg1: i32) -> (i32, i32) {
    %c0_i32 = arith.constant 0 : i32
    %c0_i32_0 = arith.constant 0 : i32
    %c0_i32_1 = arith.constant 0 : i32
    return %c0_i32, %c0_i32_0 : i32, i32
  }
  func.func @transform_11(%arg0: i32, %arg1: i32) -> (i32, i32) {
    %c0_i32 = arith.constant 0 : i32
    %c0_i32_0 = arith.constant 0 : i32
    %c0_i32_1 = arith.constant 0 : i32
    return %c0_i32, %c0_i32_0 : i32, i32
  }
  func.func @transform_12(%arg0: i32, %arg1: i32) -> (i32, i32) {
    %c0_i32 = arith.constant 0 : i32
    %c0_i32_0 = arith.constant 0 : i32
    %c0_i32_1 = arith.constant 0 : i32
    return %c0_i32, %c0_i32_0 : i32, i32
  }
  func.func @transform_13(%arg0: i32, %arg1: i32) -> (i32, i32) {
    %c0_i32 = arith.constant 0 : i32
    %c0_i32_0 = arith.constant 0 : i32
    %c0_i32_1 = arith.constant 0 : i32
    return %c0_i32, %c0_i32_0 : i32, i32
  }
  func.func @transform_14(%arg0: i32, %arg1: i32) -> (i32, i32) {
    %c0_i32 = arith.constant 0 : i32
    %c0_i32_0 = arith.constant 0 : i32
    %c0_i32_1 = arith.constant 0 : i32
    return %c0_i32, %c0_i32_0 : i32, i32
  }
  func.func @transform_15(%arg0: i32, %arg1: i32) -> (i32, i32) {
    %c0_i32 = arith.constant 0 : i32
    %c0_i32_0 = arith.constant 0 : i32
    %c0_i32_1 = arith.constant 0 : i32
    return %c0_i32, %c0_i32_0 : i32, i32
  }
  func.func @transform_16(%arg0: i32, %arg1: i32) -> (i32, i32) {
    %c0_i32 = arith.constant 0 : i32
    %c0_i32_0 = arith.constant 0 : i32
    %c0_i32_1 = arith.constant 0 : i32
    return %c0_i32, %c0_i32_0 : i32, i32
  }
  func.func @transform_17(%arg0: i32, %arg1: i32) -> (i32, i32) {
    %c0_i32 = arith.constant 0 : i32
    %c0_i32_0 = arith.constant 0 : i32
    %c0_i32_1 = arith.constant 0 : i32
    return %c0_i32, %c0_i32_0 : i32, i32
  }
  func.func @transform_18(%arg0: i32, %arg1: i32) -> (i32, i32) {
    %c0_i32 = arith.constant 0 : i32
    %c0_i32_0 = arith.constant 0 : i32
    %c0_i32_1 = arith.constant 0 : i32
    return %c0_i32, %c0_i32_0 : i32, i32
  }
  func.func @transform_19(%arg0: i32, %arg1: i32) -> (i32, i32) {
    %c0_i32 = arith.constant 0 : i32
    %c0_i32_0 = arith.constant 0 : i32
    %c0_i32_1 = arith.constant 0 : i32
    return %c0_i32, %c0_i32_0 : i32, i32
  }
  func.func @transform_20(%arg0: i32, %arg1: i32) -> (i32, i32) {
    %c1_i32 = arith.constant 1 : i32
    %0 = arith.muli %arg0, %c1_i32 : i32
    %1 = arith.addi %0, %arg1 : i32
    %c0_i32 = arith.constant 0 : i32
    %c0_i32_0 = arith.constant 0 : i32
    return %c0_i32, %1 : i32, i32
  }
  func.func @transform_21(%arg0: i32, %arg1: i32) -> (i32, i32, i32) {
    %c0_i32 = arith.constant 0 : i32
    %c0_i32_0 = arith.constant 0 : i32
    %c0_i32_1 = arith.constant 0 : i32
    return %arg0, %c0_i32, %c0_i32_0 : i32, i32, i32
  }
  func.func @transform_22(%arg0: i32, %arg1: i32) -> (i32, i32, i32) {
    %c0_i32 = arith.constant 0 : i32
    %c0_i32_0 = arith.constant 0 : i32
    %c0_i32_1 = arith.constant 0 : i32
    return %arg0, %c0_i32, %c0_i32_0 : i32, i32, i32
  }
}

</mosaic_0001>

<bundles_post_ra>
// kernel: tpu_custom_call.1
= control target key start
LH: loop header
LB: loop body
LE: loop exit
PB: predicated region body
PF: predicated region fallthrough
CT: control target
= control target key end

     0   :  { %s2060_s0 = inlined_call_operand.vmem [shape: s32[1,128], index: 0, kind: input, shape index: {}]   ;;  %s2061_s1 = inlined_call_operand.hbm [shape: bf16[8,32], index: 1, kind: input, shape index: {}]   ;;  %s2062_s2 = inlined_call_operand.vmem [shape: bf16[128,32], index: 2, kind: input, shape index: {}]   ;;  %s2063_s3 = inlined_call_operand.vmem [shape: bf16[32,32], index: 3, kind: input, shape index: {}]   ;;  %s2064_s4 = inlined_call_operand.hbm [shape: f32[1,32], index: 4, kind: input, shape index: {}]   ;;  %s2065_s5 = inlined_call_operand.vmem [shape: bf16[32,32], index: 5, kind: input, shape index: {}]   ;;  %s2066_s6 = inlined_call_operand.hbm [shape: f32[1,32], index: 6, kind: input, shape index: {}]   ;;  %s2067_s7 = inlined_call_operand.vmem [shape: bf16[32,32], index: 7, kind: input, shape index: {}]   ;;  %s2068_s8 = inlined_call_operand.hbm [shape: f32[1,32], index: 8, kind: input, shape index: {}]   ;;  %s2069_s9 = inlined_call_operand.vmem [shape: bf16[32,32], index: 9, kind: input, shape index: {}]   ;;  %s2070_s10 = inlined_call_operand.hbm [shape: f32[1,32], index: 10, kind: input, shape index: {}]   ;;  %s2071_s11 = inlined_call_operand.vmem [shape: bf16[32,32], index: 11, kind: input, shape index: {}]   ;;  %s2072_s12 = inlined_call_operand.hbm [shape: f32[1,32], index: 12, kind: input, shape index: {}]   ;;  %s2073_s13 = inlined_call_operand.hbm [shape: bf16[32,32], index: 13, kind: input, shape index: {}]   ;;  %s2074_s14 = inlined_call_operand.hbm [shape: f32[1,32], index: 14, kind: input, shape index: {}]   ;;  %s2075_s15 = inlined_call_operand.hbm [shape: bf16[32,32], index: 15, kind: input, shape index: {}]   ;;  %s2076_s16 = inlined_call_operand.vmem [shape: bf16[32,32], index: 16, kind: input, shape index: {}]   ;;  %s2077_s17 = inlined_call_operand.hbm [shape: f32[1,32], index: 17, kind: input, shape index: {}]   ;;  %s2078_s18 = inlined_call_operand.vmem [shape: bf16[1,32], index: 18, kind: input, shape index: {}]   ;;  %s2079_s19 = inlined_call_operand.<no memory space> [shape: f32[1,1], index: 19, kind: input, shape index: {}]   ;;  %s2080_s20 = inlined_call_operand.hbm [shape: f32[1,128], index: 20, kind: output, shape index: {0}]   ;;  %s2081_s21 = inlined_call_operand.vmem [shape: f32[1,8,1], index: 21, kind: output, shape index: {1}]   ;;  %s2082_s22 = inlined_call_operand.vmem [shape: f32[1,8,1], index: 22, kind: output, shape index: {2}]  }
   0x1   :  { %2086 = sst [smem:[#allocation29_spill]] %s2060_s0  ;;  %v28_v0 = vstv %s2079_s19 }
   0x2   :  { %2087 = sst [smem:[#allocation30_spill]] %s2061_s1  ;;  %29 = vst [vmem:[#allocation3] sm:$0x1] %v28_v0 }
   0x3   :  { %2088 = sst [smem:[#allocation31_spill]] %s2062_s2 }
   0x4   :  { %2089 = sst [smem:[#allocation32_spill]] %s2063_s3 }
   0x5   :  { %2090 = sst [smem:[#allocation33_spill]] %s2064_s4 }
   0x6   :  { %2091 = sst [smem:[#allocation34_spill]] %s2065_s5 }
   0x7   :  { %2092 = sst [smem:[#allocation35_spill]] %s2066_s6 }
   0x8   :  { %30 = vsyncpa [#allocation5], 0 }
   0x9   :  { %31 = vsyncpa [#allocation8], 0 }
   0xa   :  { %32 = vsyncpa [#allocation11], 0 }
   0xb   :  { %33 = vsyncpa [#allocation14], 0 }
   0xc   :  { %34 = vsyncpa [#allocation17], 0 }
   0xd   :  { %35 = vsyncpa [#allocation20], 0  ;;  %s2093_s4 = sld [smem:[#allocation33_spill]] }
  0x13   :  { %s72_s0 = sshll.u32 %s2093_s4, 4  ;;  %s73_s0 = int_to_ptr.hbm [resolvable:$true] %s72_s0 }
  0x14   :  { %36 = vsyncpa [#allocation6], 0  ;;  %s1653_s23 = smov [#allocation7]   ;;  %s98_s19 = sshll.u32 %s2068_s8, 4  ;;  %s99_s19 = int_to_ptr.hbm [resolvable:$true] %s98_s19 }
  0x15   :  { %s74_s1 = sshll.u32 %s1653_s23, 4  ;;  %s1654_s6 = smov [#allocation10]   ;;  %s75_s1 = int_to_ptr.vmem [resolvable:$true] %s74_s1 }
  0x16   :  { %77 = dma.hbm_to_vmem [thread:$0]  %s73_s0, 16, %s75_s1, [#allocation8]  }
  0x17   :  { %s100_s25 = sshll.u32 %s1654_s6, 4  ;;  %s124_s27 = sshll.u32 %s2072_s12, 4  ;;  %s101_s25 = int_to_ptr.vmem [resolvable:$true] %s100_s25  ;;  %s125_s27 = int_to_ptr.hbm [resolvable:$true] %s124_s27 }
  0x18   :  { %103 = dma.hbm_to_vmem [thread:$0]  %s99_s19, 16, %s101_s25, [#allocation11]  }
  0x19   :  { %s148_s29 = sshll.u32 %s2074_s14, 4  ;;  %s1655_s30 = smov [#allocation13]   ;;  %s149_s29 = int_to_ptr.hbm [resolvable:$true] %s148_s29 }
  0x1a   :  { %s126_s4 = sshll.u32 %s1655_s30, 4  ;;  %s1656_s8 = smov [#allocation16]   ;;  %s127_s4 = int_to_ptr.vmem [resolvable:$true] %s126_s4 }
  0x1b   :  { %129 = dma.hbm_to_vmem [thread:$0]  %s125_s27, 16, %s127_s4, [#allocation14]  }
  0x1c   :  { %s150_s0 = sshll.u32 %s1656_s8, 4  ;;  %s2094_s5 = sld [smem:[#allocation30_spill]]  ;;  %s151_s0 = int_to_ptr.vmem [resolvable:$true] %s150_s0 }
  0x1d   :  { %153 = dma.hbm_to_vmem [thread:$0]  %s149_s29, 16, %s151_s0, [#allocation17]  }
  0x1e   :  { %s2095_s6 = sld [smem:[#allocation35_spill]]  ;;  %s1657_s26 = smov [#allocation4]  }
  0x1f   :  { %s51_s14 = sshll.u32 %s1657_s26, 4  ;;  %s1658_s2 = smov [#allocation9]   ;;  %s52_s14 = int_to_ptr.vmem [resolvable:$true] %s51_s14 }
  0x20   :  { %s87_s27 = sshll.u32 %s1658_s2, 4  ;;  %s111_s30 = sshll.u32 %s2070_s10, 4  ;;  %s88_s27 = int_to_ptr.vmem [resolvable:$true] %s87_s27  ;;  %s112_s30 = int_to_ptr.hbm [resolvable:$true] %s111_s30 }
  0x21   :  { %s134_s8 = sshll.u32 %s2073_s13, 4  ;;  %s1659_s0 = smov [#allocation12]   ;;  %s135_s8 = int_to_ptr.hbm [resolvable:$true] %s134_s8 }
  0x22   :  { %s49_s24 = sshll.u32 %s2094_s5, 4  ;;  %s113_s23 = sshll.u32 %s1659_s0, 4  ;;  %s50_s24 = int_to_ptr.hbm [resolvable:$true] %s49_s24  ;;  %s114_s23 = int_to_ptr.vmem [resolvable:$true] %s113_s23 }
  0x23   :  { %54 = dma.hbm_to_vmem [thread:$0]  %s50_s24, 64, %s52_s14, [#allocation5]  }
  0x24   :  { %s85_s25 = sshll.u32 %s2095_s6, 4  ;;  %s1660_s1 = smov [#allocation15]   ;;  %s86_s25 = int_to_ptr.hbm [resolvable:$true] %s85_s25 }
  0x25   :  { %90 = dma.hbm_to_vmem [thread:$0]  %s86_s25, 16, %s88_s27, [#allocation8]  }
  0x26   :  { %116 = dma.hbm_to_vmem [thread:$0]  %s112_s30, 16, %s114_s23, [#allocation11]  }
  0x27   :  { %s136_s5 = sshll.u32 %s1660_s1, 4  ;;  %s1661_s24 = smov 64   ;;  %s137_s5 = int_to_ptr.vmem [resolvable:$true] %s136_s5 }
  0x28   :  { %s1662_s12 = smov 4   ;;  %s158_s6 = sshll.u32 %s2075_s15, 4  ;;  %s159_s6 = int_to_ptr.hbm [resolvable:$true] %s158_s6 }
  0x29   :  { %142 = dma.hbm_to_vmem [thread:$0]  %s135_s8, 256, %s137_s5, [#allocation14], %s1661_s24, %s1661_s24, %s1662_s12  }
  0x2a   :  { %s1663_s25 = smov [#allocation18]   ;;  %s174_s2 = sshll.u32 %s2077_s17, 4  ;;  %s175_s2 = int_to_ptr.hbm [resolvable:$true] %s174_s2 }
  0x2b   :  { %s160_s26 = sshll.u32 %s1663_s25, 4  ;;  %s1664_s27 = smov [#allocation19]   ;;  %s161_s26 = int_to_ptr.vmem [resolvable:$true] %s160_s26 }
  0x2c   :  { %166 = dma.hbm_to_vmem [thread:$0]  %s159_s6, 256, %s161_s26, [#allocation17], %s1661_s24, %s1661_s24, %s1662_s12  }
  0x2d   :  { %s176_s3 = sshll.u32 %s1664_s27, 4  ;;  %s177_s3 = int_to_ptr.vmem [resolvable:$true] %s176_s3 }
  0x2e   :  { %179 = dma.hbm_to_vmem [thread:$0]  %s175_s2, 16, %s177_s3, [#allocation20]  }
  0x2f   :  { %1639 = dma.done.wait [#allocation5], 64  }
  0x30   :  { %1640 = vsyncadd [#allocation5], 4294967232 }
  0x31   :  { %1641 = dma.done.wait [#allocation8], 32  }
  0x32   :  { %1642 = vsyncadd [#allocation8], 4294967264 }
  0x33   :  { %1643 = dma.done.wait [#allocation11], 32  }
  0x34   :  { %1644 = vsyncadd [#allocation11], 4294967264 }
  0x35   :  { %1645 = dma.done.wait [#allocation14], 272  }
  0x36   :  { %1646 = vsyncadd [#allocation14], 4294967024 }
  0x37   :  { %1647 = dma.done.wait [#allocation17], 272  }
  0x38   :  { %1648 = vsyncadd [#allocation17], 4294967024 }
  0x39   :  { %1649 = dma.done.wait [#allocation20], 16  }
  0x3a   :  { %1650 = vsyncadd [#allocation20], 4294967280  ;;  %s2096_s28 = sld [smem:[#allocation32_spill]]  ;;  %v256_v3 = vld [vmem:[#allocation4] sm:$0xf]  ;;  %vm277_vm0 = vcmask 261120  }
  0x3b   :  { %v1320_v4 = vld [vmem:[%s2067_s7 + $0x8] sm:$0xff]  ;;  %v1319_v5 = vld [vmem:[%s2067_s7] sm:$0xff]  ;;  %s2097_s10 = sld [smem:[#allocation34_spill]]  ;;  %v1365_v35 = vld [vmem:[#allocation13] ss:$0 sm:$0xff]  ;;  %vm253_vm2 = vcmask 7168  }
  0x3c   :  { %v1363_v6 = vld [vmem:[#allocation7] ss:$0 sm:$0xff]  ;;  %v1321_v13 = vld [vmem:[%s2071_s11] sm:$0xff]  ;;  %s2098_s14 = sld [smem:[#allocation31_spill]]  ;;  %v1364_v17 = vld [vmem:[#allocation10] ss:$0 sm:$0xff] }
  0x3d   :  { %v1322_v12 = vld [vmem:[%s2071_s11 + $0x8] sm:$0xff]  ;;  %v1335_v33 = vld [vmem:[%s2069_s9] sm:$0xff]  ;;  %vm405_vm3 = vcmask 257024   ;;  %vm954_vm4 = vcmask 1043456   ;;  %vm929_vm5 = vcmask 64512   ;;  %s1668_s30 = smov [#allocation21]  }
  0x3e   :  { %363 = vmatpush.bf16.msra.mxu2 %v1322_v12  ;;  %v1324_v28 = vld [vmem:[#allocation18 + $0x8] sm:$0xff]  ;;  %v1323_v29 = vld [vmem:[#allocation18] sm:$0xff]  ;;  %s1141_s4 = sshll.u32 %s1668_s30, 4  ;;  %s1143_s0 = sshll.u32 %s2080_s20, 4  ;;  %s1142_s4 = int_to_ptr.vmem [resolvable:$true] %s1141_s4  ;;  %s1144_s0 = int_to_ptr.hbm [resolvable:$true] %s1143_s0 }
  0x3f   :  { %397 = vmatpush.bf16.msra.mxu3 %v1324_v28  ;;  %v1336_v31 = vld [vmem:[%s2069_s9 + $0x8] sm:$0xff] }
  0x40   :  { %v1318_v1 = vld [vmem:[%s2096_s28 + $0x8] sm:$0xff]  ;;  %v1317_v2 = vld [vmem:[%s2096_s28] sm:$0xff] }
  0x41   :  { %287 = vmatpush.bf16.msra.mxu1 %v1318_v1  ;;  %v1334_v14 = vld [vmem:[%s2097_s10 + $0x8] sm:$0xff]  ;;  %v1333_v15 = vld [vmem:[%s2097_s10] sm:$0xff]  ;;  %s2099_s10 = sld [smem:[#allocation29_spill]] }
  0x42   :  { %364 = vmatpush.bf16.msra.mxu2 %v1321_v13  ;;  %514 = vmatpush.bf16.msra.mxu0 %v1334_v14  ;;  %v1325_v16 = vld [vmem:[%s2098_s14] sm:$0xff]  ;;  %v1326_v18 = vld [vmem:[%s2098_s14 + $0x8] sm:$0xff]  ;;  %v1327_v24 = vld [vmem:[%s2098_s14 + $0x10] sm:$0xff] }
  0x43   :  { %v1328_v25 = vld [vmem:[%s2098_s14 + $0x18] sm:$0xff]  ;;  %v1329_v26 = vld [vmem:[%s2098_s14 + $0x20] sm:$0xff]  ;;  %v1330_v27 = vld [vmem:[%s2098_s14 + $0x28] sm:$0xff]  ;;  %398 = vmatpush.bf16.msra.mxu3 %v1323_v29 }
  0x44   :  { %v1871_v32 = vld [vmem:[#allocation9] ss:$0 sm:$0xff]  ;;  %v1331_v52 = vld [vmem:[%s2098_s14 + $0x30] sm:$0xff]  ;;  %v1332_v62 = vld [vmem:[%s2098_s14 + $0x38] sm:$0xff] }
  0x45   :  { %288 = vmatpush.bf16.msra.mxu1 %v1317_v2 }
  0x46   :  { %1341 = vmatpush.bf16.msrb.mxu2 %v1334_v14  ;;  %515 = vmatpush.bf16.msra.mxu0 %v1333_v15 }
  0x47   :  { %1342 = vmatpush.bf16.msrb.mxu3 %v1334_v14 }
  0x48   :  { %1183 = vmatmul.msk.bf16.vlgmr.msra.gmra.mxu1 %vm277_vm0, %v256_v3 }
  0x49   :  { %325 = vmatpush.bf16.msrb.mxu1 %v1320_v4  ;;  %1251 = vmatmul.msk.bf16.vlgmr.msra.gmra.mxu0 %vm277_vm0, %v1325_v16 }
  0x4a   :  { %1343 = vmatpush.bf16.msrb.mxu2 %v1333_v15 }
  0x4b   :  { %1344 = vmatpush.bf16.msrb.mxu3 %v1333_v15 }
  0x4d   :  { %326 = vmatpush.bf16.msrb.mxu1 %v1319_v5 }
  0x51   :  { %631 = vmatpush.bf16.msra.mxu1 %v1336_v31  ;;  %v1338_v31 = vld [vmem:[#allocation15 + $0x8] sm:$0xff] }
  0x55   :  { %632 = vmatpush.bf16.msra.mxu1 %v1335_v33 }
  0x59   :  { %1252 = vmatmul.msk.bf16.gmra.mxu0 %vm277_vm0, %v1326_v18 }
  0x69   :  { %1253 = vmatmul.msk.bf16.gmra.mxu0 %vm277_vm0, %v1327_v24 }
  0xc5   :  { %v290_v7 = vpop.f32.mrf.mxu1 }
  0xc6   :  { %v291_v8 = vadd.f32 %v1363_v6, %v290_v7  ;;  %v517_v30 = vpop.f32.mrf.mxu0 }
  0xc7   :  { %v518_v34 = vadd.f32 %v1871_v32, %v517_v30 }
  0xc8   :  { %v294_v9 = vmax.f32 %v291_v8, 0.0 }
  0xc9   :  { %v557_v38 = vmax.f32 %v518_v34, 0.0 }
  0xca   :  { %v295_v10 = vpack.c.bf16 %v294_v9, %v294_v9 }
  0xcc   :  { %1192 = vmatmul.msk.bf16.vlgmr.msrb.gmra.mxu1 %vm277_vm0, %v295_v10 }
  0xcd   :  { %v292_v11 = vpop.f32.mrf.mxu1 }
  0xce   :  { %v519_v36 = vpop.f32.mrf.mxu0 }
  0xcf   :  { %v520_v39 = vadd.f32 %v1871_v32, %v519_v36  ;;  %v1337_v36 = vld [vmem:[#allocation15] sm:$0xff] }
  0xd1   :  { %v558_v41 = vmax.f32 %v520_v39, 0.0 }
  0xd3   :  { %v573_v43 = vpack.c.bf16 %v558_v41, %v557_v38 }
  0xd6   :  { %v522_v45 = vpop.f32.mrf.mxu0 }
  0xd7   :  { %v523_v47 = vadd.f32 %v1871_v32, %v522_v45 }
  0xd9   :  { %v559_v49 = vmax.f32 %v523_v47, 0.0 }
  0xdc   :  { %1267 = vmatmul.msk.bf16.vlgmr.msra.gmra.mxu1 %vm277_vm0, %v573_v43 }
  0xde   :  { %v524_v48 = vpop.f32.mrf.mxu0 }
  0xdf   :  { %v525_v50 = vadd.f32 %v1871_v32, %v524_v48 }
  0xe1   :  { %v560_v51 = vmax.f32 %v525_v50, 0.0 }
  0xe3   :  { %v574_v53 = vpack.c.bf16 %v560_v51, %v559_v49 }
  0xe6   :  { %v527_v55 = vpop.f32.mrf.mxu0 }
  0xe7   :  { %v528_v56 = vadd.f32 %v1871_v32, %v527_v55 }
  0xe9   :  { %v561_v59 = vmax.f32 %v528_v56, 0.0 }
  0xec   :  { %1268 = vmatmul.msk.bf16.gmra.mxu1 %vm277_vm0, %v574_v53 }
  0xee   :  { %v529_v57 = vpop.f32.mrf.mxu0 }
  0xef   :  { %v530_v60 = vadd.f32 %v1871_v32, %v529_v57 }
  0xf1   :  { %v562_v61 = vmax.f32 %v530_v60, 0.0 }
  0xf3   :  { %v575_v63 = vpack.c.bf16 %v562_v61, %v561_v59 }
  0xfc   :  { %1269 = vmatmul.msk.bf16.gmra.mxu1 %vm277_vm0, %v575_v63 }
 0x149   :  { %v328_v19 = vpop.f32.mrf.mxu1 }
 0x14a   :  { %v329_v20 = vadd.f32 %v1364_v17, %v328_v19  ;;  %v792_v19 = vlaneseq }
 0x14c   :  { %v332_v21 = vmax.f32 %v329_v20, 0.0  ;;  %v1903_v20 = vshrl.u32 %v792_v19, 7 }
 0x14e   :  { %v333_v22 = vpack.c.bf16 %v332_v21, %v332_v21  ;;  %v1908_v21 = vld [vmem:[%s2099_s10] ss:$0 sm:$0xff] }
 0x14f   :  { %vm795_vm1 = vcmp.eq.s32.totalorder %v1903_v20, %v1908_v21 }
 0x150   :  { %1201 = vmatmul.msk.bf16.vlgmr.msra.gmra.mxu2 %vm277_vm0, %v333_v22  ;;  %v1665_v22 = vmov 0.0  }
 0x151   :  { %v330_v23 = vpop.f32.mrf.mxu1  ;;  %255 = vst.msk [vmem:[%s2082_s22] sm:$0xff] %vm253_vm2, %v1665_v22  ;;  %748 = vmatpush.bf16.msra.mxu2 %v1338_v31  ;;  %v1953_v31 = vld [vmem:[#allocation16] ss:$0 sm:$0xff] }
 0x152   :  { %v1915_v23 = vsel %vm795_vm1, 1.0, %v1665_v22 }
 0x153   :  { %v798_v24 = vpack.c.bf16 %v1915_v23, %v1915_v23 }
 0x155   :  { %913 = vxpose.xlu0.c.b16.start.end [1/1] (short) %v798_v24, 128  ;;  %749 = vmatpush.bf16.msra.mxu2 %v1337_v36 }
 0x160   :  { %1254 = vmatmul.msk.bf16.vlgmr.msrb.gmra.mxu2 %vm277_vm0, %v1328_v25  ;;  %v1666_v25 = vmov -1e+30  }
 0x161   :  { %254 = vst.msk [vmem:[%s2081_s21] sm:$0xff] %vm253_vm2, %v1666_v25 }
 0x170   :  { %1255 = vmatmul.msk.bf16.gmra.mxu2 %vm277_vm0, %v1329_v26  ;;  %v634_v26 = vpop.f32.mrf.mxu1 }
 0x178   :  { %v636_v33 = vpop.f32.mrf.mxu1 }
 0x180   :  { %1256 = vmatmul.msk.bf16.gmra.mxu2 %vm277_vm0, %v1330_v27  ;;  %v1927_v27 = vld [vmem:[#allocation12] ss:$0 sm:$0xff] }
 0x181   :  { %v635_v30 = vadd.f32 %v1927_v27, %v634_v26 }
 0x183   :  { %v674_v34 = vmax.f32 %v635_v30, 0.0 }
 0x1d3   :  { %v366_v37 = vpop.f32.mrf.mxu2 }
 0x1d4   :  { %v367_v40 = vadd.f32 %v1365_v35, %v366_v37  ;;  %v637_v35 = vadd.f32 %v1927_v27, %v636_v33 }
 0x1d6   :  { %v370_v42 = vmax.f32 %v367_v40, 0.0  ;;  %v675_v37 = vmax.f32 %v637_v35, 0.0 }
 0x1d8   :  { %v371_v44 = vpack.c.bf16 %v370_v42, %v370_v42  ;;  %v690_v39 = vpack.c.bf16 %v675_v37, %v674_v34  ;;  %v639_v42 = vpop.f32.mrf.mxu1  ;;  %v1340_v34 = vld [vmem:[%s2076_s16 + $0x8] sm:$0xff] }
 0x1da   :  { %1210 = vmatmul.msk.bf16.vlgmr.msra.gmra.mxu3 %vm277_vm0, %v371_v44  ;;  %1283 = vmatmul.msk.bf16.vlgmr.msra.gmra.mxu2 %vm277_vm0, %v690_v39  ;;  %v640_v44 = vadd.f32 %v1927_v27, %v639_v42 }
 0x1db   :  { %v368_v46 = vpop.f32.mrf.mxu2  ;;  %870 = vmatpush.bf16.msra.mxu3 %v1340_v34 }
 0x1dc   :  { %v676_v46 = vmax.f32 %v640_v44, 0.0 }
 0x1e0   :  { %v641_v45 = vpop.f32.mrf.mxu1 }
 0x1e1   :  { %v642_v47 = vadd.f32 %v1927_v27, %v641_v45 }
 0x1e3   :  { %v532_v54 = vpop.f32.mrf.mxu2  ;;  %v677_v49 = vmax.f32 %v642_v47, 0.0 }
 0x1e4   :  { %v533_v1 = vadd.f32 %v1871_v32, %v532_v54 }
 0x1e6   :  { %v563_v3 = vmax.f32 %v533_v1, 0.0 }
 0x1e8   :  { %v644_v55 = vpop.f32.mrf.mxu1 }
 0x1ea   :  { %1257 = vmatmul.msk.bf16.vlgmr.msrb.gmra.mxu3 %vm277_vm0, %v1331_v52  ;;  %v691_v52 = vpack.c.bf16 %v677_v49, %v676_v46 }
 0x1eb   :  { %v534_v58 = vpop.f32.mrf.mxu2 }
 0x1ec   :  { %v535_v2 = vadd.f32 %v1871_v32, %v534_v58  ;;  %1284 = vmatmul.msk.bf16.gmra.mxu2 %vm277_vm0, %v691_v52  ;;  %v645_v58 = vadd.f32 %v1927_v27, %v644_v55 }
 0x1ee   :  { %v564_v4 = vmax.f32 %v535_v2, 0.0  ;;  %v678_v60 = vmax.f32 %v645_v58, 0.0 }
 0x1f0   :  { %v576_v5 = vpack.c.bf16 %v564_v4, %v563_v3  ;;  %v646_v59 = vpop.f32.mrf.mxu1 }
 0x1f1   :  { %v647_v61 = vadd.f32 %v1927_v27, %v646_v59 }
 0x1f2   :  { %1270 = vmatmul.msk.bf16.gmra.mxu1 %vm277_vm0, %v576_v5 }
 0x1f3   :  { %v537_v0 = vpop.f32.mrf.mxu2  ;;  %v679_v63 = vmax.f32 %v647_v61, 0.0 }
 0x1f4   :  { %v538_v7 = vadd.f32 %v1871_v32, %v537_v0 }
 0x1f5   :  { %v692_v2 = vpack.c.bf16 %v679_v63, %v678_v60 }
 0x1f6   :  { %v565_v10 = vmax.f32 %v538_v7, 0.0 }
 0x1fa   :  { %1258 = vmatmul.msk.bf16.gmra.mxu3 %vm277_vm0, %v1332_v62 }
 0x1fb   :  { %v539_v6 = vpop.f32.mrf.mxu2 }
 0x1fc   :  { %v540_v8 = vadd.f32 %v1871_v32, %v539_v6  ;;  %1285 = vmatmul.msk.bf16.gmra.mxu2 %vm277_vm0, %v692_v2 }
 0x1fe   :  { %v566_v11 = vmax.f32 %v540_v8, 0.0 }
 0x200   :  { %v577_v12 = vpack.c.bf16 %v566_v11, %v565_v10 }
 0x202   :  { %1271 = vmatmul.msk.bf16.gmra.mxu1 %vm277_vm0, %v577_v12 }
 0x203   :  { %v542_v9 = vpop.f32.mrf.mxu2 }
 0x204   :  { %v543_v14 = vadd.f32 %v1871_v32, %v542_v9 }
 0x206   :  { %v567_v16 = vmax.f32 %v543_v14, 0.0 }
 0x20b   :  { %v544_v13 = vpop.f32.mrf.mxu2 }
 0x20c   :  { %v545_v15 = vadd.f32 %v1871_v32, %v544_v13 }
 0x20e   :  { %v568_v17 = vmax.f32 %v545_v15, 0.0 }
 0x210   :  { %v578_v18 = vpack.c.bf16 %v568_v17, %v567_v16 }
 0x212   :  { %1272 = vmatmul.msk.bf16.gmra.mxu1 %vm277_vm0, %v578_v18 }
 0x25d   :  { %v400_v28 = vpop.f32.mrf.mxu3  ;;  %v751_v30 = vpop.f32.mrf.mxu2 }
 0x25e   :  { %v404_v29 = vpack.c.bf16 %v400_v28, %v400_v28  ;;  %v752_v33 = vadd.f32 %v1953_v31, %v751_v30 }
 0x260   :  { %406 = vst.msk [vmem:[#allocation2] sm:$0xf] %vm405_vm3, %v404_v29  ;;  %v800_v36 = vmax.f32 %v752_v33, 0.0 }
 0x265   :  { %v402_v38 = vpop.f32.mrf.mxu3  ;;  %v753_v35 = vpop.f32.mrf.mxu2 }
 0x266   :  { %v754_v37 = vadd.f32 %v1953_v31, %v753_v35  ;;  %v1339_v38 = vld [vmem:[%s2076_s16] sm:$0xff] }
 0x267   :  { %v799_v40 = vld [vmem:[#allocation2] sm:$0xf]  ;;  %871 = vmatpush.bf16.msra.mxu3 %v1339_v38 }
 0x268   :  { %v956_v41 = vsel %vm954_vm4, %v799_v40, 0  ;;  %v801_v39 = vmax.f32 %v754_v37, 0.0 }
 0x269   :  { %965 = vmatpush.bf16.msrb.mxu0 %v956_v41 }
 0x26a   :  { %v816_v40 = vpack.c.bf16 %v801_v39, %v800_v36 }
 0x26c   :  { %1300 = vmatmul.msk.bf16.vlgmr.msra.gmra.mxu3 %vm277_vm0, %v816_v40  ;;  %v1992_v40 = vld [vmem:[#allocation19] ss:$0 sm:$0xff] }
 0x26d   :  { %v547_v43 = vpop.f32.mrf.mxu3 }
 0x26e   :  { %v548_v48 = vadd.f32 %v1871_v32, %v547_v43  ;;  %v921_v43 = vpop.trf.xlu0 }
 0x26f   :  { %v649_v5 = vpop.f32.mrf.mxu1  ;;  %v756_v42 = vpop.f32.mrf.mxu2  ;;  %1308 = vmatmul.msk.bf16.vlgmr.msrb.gmra.mxu0 %vm929_vm5, %v921_v43 }
 0x270   :  { %v569_v53 = vmax.f32 %v548_v48, 0.0  ;;  %v650_v7 = vadd.f32 %v1927_v27, %v649_v5  ;;  %v757_v45 = vadd.f32 %v1953_v31, %v756_v42 }
 0x272   :  { %v680_v9 = vmax.f32 %v650_v7, 0.0 }
 0x275   :  { %v549_v50 = vpop.f32.mrf.mxu3 }
 0x276   :  { %v550_v51 = vadd.f32 %v1871_v32, %v549_v50  ;;  %v922_v58 = vpop.trf.xlu0 }
 0x277   :  { %v651_v8 = vpop.f32.mrf.mxu1  ;;  %v758_v48 = vpop.f32.mrf.mxu2 }
 0x278   :  { %v570_v54 = vmax.f32 %v550_v51, 0.0  ;;  %v652_v10 = vadd.f32 %v1927_v27, %v651_v8  ;;  %v802_v51 = vmax.f32 %v757_v45, 0.0  ;;  %v759_v52 = vadd.f32 %v1953_v31, %v758_v48 }
 0x27a   :  { %v579_v56 = vpack.c.bf16 %v570_v54, %v569_v53  ;;  %v681_v11 = vmax.f32 %v652_v10, 0.0  ;;  %v803_v54 = vmax.f32 %v759_v52, 0.0 }
 0x27c   :  { %1273 = vmatmul.msk.bf16.gmra.mxu1 %vm277_vm0, %v579_v56  ;;  %v693_v12 = vpack.c.bf16 %v681_v11, %v680_v9  ;;  %v817_v55 = vpack.c.bf16 %v803_v54, %v802_v51 }
 0x27d   :  { %v552_v57 = vpop.f32.mrf.mxu3 }
 0x27e   :  { %v553_v62 = vadd.f32 %v1871_v32, %v552_v57  ;;  %1286 = vmatmul.msk.bf16.gmra.mxu2 %vm277_vm0, %v693_v12  ;;  %1301 = vmatmul.msk.bf16.gmra.mxu3 %vm277_vm0, %v817_v55  ;;  %v923_v8 = vpop.trf.xlu0 }
 0x27f   :  { %v761_v57 = vpop.f32.mrf.mxu2  ;;  %1309 = vmatmul.msk.bf16.gmra.mxu0 %vm929_vm5, %v922_v58 }
 0x280   :  { %v571_v3 = vmax.f32 %v553_v62, 0.0  ;;  %v762_v60 = vadd.f32 %v1953_v31, %v761_v57 }
 0x282   :  { %v804_v2 = vmax.f32 %v762_v60, 0.0 }
 0x285   :  { %v554_v0 = vpop.f32.mrf.mxu3 }
 0x286   :  { %v555_v1 = vadd.f32 %v1871_v32, %v554_v0  ;;  %v654_v32 = vpop.f32.mrf.mxu1 }
 0x287   :  { %v655_v13 = vadd.f32 %v1927_v27, %v654_v32  ;;  %v763_v63 = vpop.f32.mrf.mxu2 }
 0x288   :  { %v572_v4 = vmax.f32 %v555_v1, 0.0 }
 0x289   :  { %v682_v15 = vmax.f32 %v655_v13, 0.0 }
 0x28a   :  { %v580_v6 = vpack.c.bf16 %v572_v4, %v571_v3  ;;  %v764_v3 = vadd.f32 %v1953_v31, %v763_v63 }
 0x28c   :  { %1274 = vmatmul.msk.bf16.gmra.mxu1 %vm277_vm0, %v580_v6  ;;  %v805_v5 = vmax.f32 %v764_v3, 0.0 }
 0x28e   :  { %v656_v14 = vpop.f32.mrf.mxu1  ;;  %v818_v6 = vpack.c.bf16 %v805_v5, %v804_v2 }
 0x28f   :  { %v657_v16 = vadd.f32 %v1927_v27, %v656_v14  ;;  %1310 = vmatmul.msk.bf16.gmra.mxu0 %vm929_vm5, %v923_v8  ;;  %v924_v14 = vpop.trf.xlu0 }
 0x290   :  { %1302 = vmatmul.msk.bf16.gmra.mxu3 %vm277_vm0, %v818_v6 }
 0x291   :  { %v683_v17 = vmax.f32 %v657_v16, 0.0 }
 0x293   :  { %v694_v18 = vpack.c.bf16 %v683_v17, %v682_v15 }
 0x295   :  { %1287 = vmatmul.msk.bf16.gmra.mxu2 %vm277_vm0, %v694_v18 }
 0x296   :  { %v659_v19 = vpop.f32.mrf.mxu1 }
 0x297   :  { %v660_v22 = vadd.f32 %v1927_v27, %v659_v19 }
 0x299   :  { %v684_v25 = vmax.f32 %v660_v22, 0.0 }
 0x29e   :  { %v661_v24 = vpop.f32.mrf.mxu1 }
 0x29f   :  { %v662_v26 = vadd.f32 %v1927_v27, %v661_v24  ;;  %1311 = vmatmul.msk.bf16.gmra.mxu0 %vm929_vm5, %v924_v14 }
 0x2a1   :  { %v685_v28 = vmax.f32 %v662_v26, 0.0 }
 0x2a3   :  { %v695_v29 = vpack.c.bf16 %v685_v28, %v684_v25  ;;  %v925_v25 = vpop.trf.xlu0 }
 0x2a5   :  { %1288 = vmatmul.msk.bf16.gmra.mxu2 %vm277_vm0, %v695_v29 }
 0x2ab   :  { %v926_v35 = vpop.trf.xlu0 }
 0x2af   :  { %1312 = vmatmul.msk.bf16.gmra.mxu0 %vm929_vm5, %v925_v25 }
 0x2b3   :  { %v927_v36 = vpop.trf.xlu0 }
 0x2bb   :  { %v928_v45 = vpop.trf.xlu0 }
 0x2bf   :  { %1313 = vmatmul.msk.bf16.gmra.mxu0 %vm929_vm5, %v926_v35 }
 0x2cf   :  { %1314 = vmatmul.msk.bf16.gmra.mxu0 %vm929_vm5, %v927_v36 }
 0x2df   :  { %1315 = vmatmul.msk.bf16.gmra.mxu0 %vm929_vm5, %v928_v45 }
 0x2ec   :  { %v967_v38 = vpop.f32.mrf.mxu0 }
 0x2ef   :  { %v873_v37 = vpop.f32.mrf.mxu3 }
 0x2f0   :  { %v968_v39 = vadd.f32 %v967_v38, %v873_v37 }
 0x2f4   :  { %v969_v43 = vpop.f32.mrf.mxu0 }
 0x2f7   :  { %v875_v42 = vpop.f32.mrf.mxu3 }
 0x2f9   :  { %v664_v41 = vpop.f32.mrf.mxu1 }
 0x2fa   :  { %v665_v44 = vadd.f32 %v1927_v27, %v664_v41  ;;  %v1011_v41 = vadd.f32 %v1992_v40, %v968_v39 }
 0x2fc   :  { %v686_v49 = vmax.f32 %v665_v44, 0.0  ;;  %v970_v44 = vadd.f32 %v969_v43, %v875_v42  ;;  %v972_v52 = vpop.f32.mrf.mxu0 }
 0x301   :  { %v666_v46 = vpop.f32.mrf.mxu1  ;;  %v766_v7 = vpop.f32.mrf.mxu2 }
 0x302   :  { %v667_v47 = vadd.f32 %v1927_v27, %v666_v46  ;;  %v767_v9 = vadd.f32 %v1953_v31, %v766_v7  ;;  %v1027_v46 = vmax.f32 %v1011_v41, 0.0  ;;  %v878_v51 = vpop.f32.mrf.mxu3 }
 0x304   :  { %v687_v50 = vmax.f32 %v667_v47, 0.0  ;;  %v806_v10 = vmax.f32 %v767_v9, 0.0  ;;  %v1012_v47 = vadd.f32 %v1992_v40, %v970_v44 }
 0x306   :  { %v696_v53 = vpack.c.bf16 %v687_v50, %v686_v49  ;;  %v1028_v48 = vmax.f32 %v1012_v47, 0.0 }
 0x308   :  { %1289 = vmatmul.msk.bf16.gmra.mxu2 %vm277_vm0, %v696_v53  ;;  %v1997_v50 = vpack.c.bf16 %v1028_v48, %v1027_v46  ;;  %v973_v53 = vadd.f32 %v972_v52, %v878_v51 }
 0x309   :  { %v669_v56 = vpop.f32.mrf.mxu1 }
 0x30a   :  { %v670_v59 = vadd.f32 %v1927_v27, %v669_v56  ;;  %v1013_v57 = vadd.f32 %v1992_v40, %v973_v53  ;;  %v880_v58 = vpop.f32.mrf.mxu3 }
 0x30c   :  { %v688_v0 = vmax.f32 %v670_v59, 0.0  ;;  %v974_v59 = vpop.f32.mrf.mxu0 }
 0x311   :  { %v671_v61 = vpop.f32.mrf.mxu1 }
 0x312   :  { %v672_v62 = vadd.f32 %v1927_v27, %v671_v61  ;;  %v768_v27 = vpop.f32.mrf.mxu2 }
 0x313   :  { %v769_v11 = vadd.f32 %v1953_v31, %v768_v27  ;;  %v883_v5 = vpop.f32.mrf.mxu3 }
 0x314   :  { %v689_v1 = vmax.f32 %v672_v62, 0.0  ;;  %v975_v62 = vadd.f32 %v974_v59, %v880_v58  ;;  %v977_v6 = vpop.f32.mrf.mxu0 }
 0x315   :  { %v807_v12 = vmax.f32 %v769_v11, 0.0  ;;  %v978_v7 = vadd.f32 %v977_v6, %v883_v5 }
 0x316   :  { %v697_v4 = vpack.c.bf16 %v689_v1, %v688_v0  ;;  %v1029_v0 = vmax.f32 %v1013_v57, 0.0  ;;  %v1014_v1 = vadd.f32 %v1992_v40, %v975_v62 }
 0x317   :  { %v819_v32 = vpack.c.bf16 %v807_v12, %v806_v10  ;;  %v1015_v10 = vadd.f32 %v1992_v40, %v978_v7 }
 0x318   :  { %1290 = vmatmul.msk.bf16.gmra.mxu2 %vm277_vm0, %v697_v4  ;;  %v1030_v2 = vmax.f32 %v1014_v1, 0.0 }
 0x319   :  { %1303 = vmatmul.msk.bf16.gmra.mxu3 %vm277_vm0, %v819_v32 }
 0x31a   :  { %v771_v13 = vpop.f32.mrf.mxu2  ;;  %v2004_v4 = vpack.c.bf16 %v1030_v2, %v1029_v0 }
 0x31b   :  { %v772_v15 = vadd.f32 %v1953_v31, %v771_v13  ;;  %v885_v11 = vpop.f32.mrf.mxu3 }
 0x31c   :  { %v979_v12 = vpop.f32.mrf.mxu0 }
 0x31d   :  { %v808_v17 = vmax.f32 %v772_v15, 0.0  ;;  %v980_v14 = vadd.f32 %v979_v12, %v885_v11 }
 0x322   :  { %v773_v16 = vpop.f32.mrf.mxu2 }
 0x323   :  { %v774_v18 = vadd.f32 %v1953_v31, %v773_v16  ;;  %v1031_v16 = vmax.f32 %v1015_v10, 0.0 }
 0x325   :  { %v809_v19 = vmax.f32 %v774_v18, 0.0 }
 0x327   :  { %v820_v22 = vpack.c.bf16 %v809_v19, %v808_v17  ;;  %v1016_v17 = vadd.f32 %v1992_v40, %v980_v14 }
 0x329   :  { %1304 = vmatmul.msk.bf16.gmra.mxu3 %vm277_vm0, %v820_v22  ;;  %v1032_v18 = vmax.f32 %v1016_v17, 0.0 }
 0x32a   :  { %v776_v24 = vpop.f32.mrf.mxu2 }
 0x32b   :  { %v777_v26 = vadd.f32 %v1953_v31, %v776_v24  ;;  %v2011_v19 = vpack.c.bf16 %v1032_v18, %v1031_v16  ;;  %v982_v24 = vpop.f32.mrf.mxu0 }
 0x32d   :  { %v810_v29 = vmax.f32 %v777_v26, 0.0 }
 0x332   :  { %v778_v28 = vpop.f32.mrf.mxu2 }
 0x333   :  { %v779_v30 = vadd.f32 %v1953_v31, %v778_v28  ;;  %v984_v28 = vpop.f32.mrf.mxu0 }
 0x335   :  { %v811_v33 = vmax.f32 %v779_v30, 0.0 }
 0x337   :  { %v821_v34 = vpack.c.bf16 %v811_v33, %v810_v29 }
 0x339   :  { %1305 = vmatmul.msk.bf16.gmra.mxu3 %vm277_vm0, %v821_v34 }
 0x33b   :  { %v987_v37 = vpop.f32.mrf.mxu0 }
 0x343   :  { %v989_v42 = vpop.f32.mrf.mxu0 }
 0x34b   :  { %v992_v48 = vpop.f32.mrf.mxu0 }
 0x353   :  { %v994_v51 = vpop.f32.mrf.mxu0 }
 0x35b   :  { %v997_v53 = vpop.f32.mrf.mxu0 }
 0x38b   :  { %v781_v49 = vpop.f32.mrf.mxu2 }
 0x38c   :  { %v782_v54 = vadd.f32 %v1953_v31, %v781_v49 }
 0x38e   :  { %v812_v60 = vmax.f32 %v782_v54, 0.0 }
 0x393   :  { %v783_v55 = vpop.f32.mrf.mxu2 }
 0x394   :  { %v784_v56 = vadd.f32 %v1953_v31, %v783_v55  ;;  %v999_v55 = vpop.f32.mrf.mxu0 }
 0x396   :  { %v813_v61 = vmax.f32 %v784_v56, 0.0 }
 0x398   :  { %v822_v63 = vpack.c.bf16 %v813_v61, %v812_v60 }
 0x39a   :  { %1306 = vmatmul.msk.bf16.gmra.mxu3 %vm277_vm0, %v822_v63 }
 0x39b   :  { %v786_v3 = vpop.f32.mrf.mxu2 }
 0x39c   :  { %v787_v8 = vadd.f32 %v1953_v31, %v786_v3  ;;  %v888_v22 = vpop.f32.mrf.mxu3  ;;  %v1002_v57 = vpop.f32.mrf.mxu0 }
 0x39d   :  { %v983_v25 = vadd.f32 %v982_v24, %v888_v22 }
 0x39e   :  { %v814_v32 = vmax.f32 %v787_v8, 0.0 }
 0x3a3   :  { %v788_v9 = vpop.f32.mrf.mxu2 }
 0x3a4   :  { %v789_v27 = vadd.f32 %v1953_v31, %v788_v9  ;;  %v1017_v31 = vadd.f32 %v1992_v40, %v983_v25  ;;  %v890_v26 = vpop.f32.mrf.mxu3  ;;  %v1004_v60 = vpop.f32.mrf.mxu0 }
 0x3a5   :  { %v985_v29 = vadd.f32 %v984_v28, %v890_v26  ;;  %v1667_v26 = vmov 0   ;;  %v1066_v28 = vsel %vm277_vm0, %v2004_v4, 0 }
 0x3a6   :  { %v815_v13 = vmax.f32 %v789_v27, 0.0  ;;  %v1033_v30 = vmax.f32 %v1017_v31, 0.0  ;;  %v1052_v31 = vld [vmem:[#allocation3] sm:$0x1]  ;;  %1361 = vset.pattern.permute.xlu0 %v1667_v26  ;;  %1362 = vset.pattern.permute.xlu1 %v1667_v26 }
 0x3a7   :  { %v1018_v33 = vadd.f32 %v1992_v40, %v985_v29  ;;  %1055 = vperm.xlu0 %1361, %v1052_v31   ;;  %v1063_v29 = vsel %vm277_vm0, %v1997_v50, 0  ;;  %v1104_v50 = vld [vmem:[%s2081_s21] sm:$0xff] }
 0x3a8   :  { %v823_v15 = vpack.c.bf16 %v815_v13, %v814_v32 }
 0x3a9   :  { %v1034_v34 = vmax.f32 %v1018_v33, 0.0 }
 0x3aa   :  { %1307 = vmatmul.msk.bf16.gmra.mxu3 %vm277_vm0, %v823_v15 }
 0x3ab   :  { %v1046_v35 = vpack.c.bf16 %v1034_v34, %v1033_v30  ;;  %v1051_v30 = vld [vmem:[%s2078_s18] sm:$0x1] }
 0x3ac   :  { %v893_v36 = vpop.f32.mrf.mxu3 }
 0x3ad   :  { %v988_v38 = vadd.f32 %v987_v37, %v893_v36  ;;  %v1072_v25 = vsel %vm277_vm0, %v1046_v35, 0 }
 0x3af   :  { %v1019_v39 = vadd.f32 %v1992_v40, %v988_v38 }
 0x3b1   :  { %v1035_v44 = vmax.f32 %v1019_v39, 0.0 }
 0x3b4   :  { %v895_v41 = vpop.f32.mrf.mxu3 }
 0x3b5   :  { %v990_v43 = vadd.f32 %v989_v42, %v895_v41 }
 0x3b7   :  { %v1020_v45 = vadd.f32 %v1992_v40, %v990_v43 }
 0x3b9   :  { %v1036_v46 = vmax.f32 %v1020_v45, 0.0 }
 0x3bb   :  { %v1047_v47 = vpack.c.bf16 %v1036_v46, %v1035_v44 }
 0x3bc   :  { %v898_v49 = vpop.f32.mrf.mxu3 }
 0x3bd   :  { %v993_v9 = vadd.f32 %v992_v48, %v898_v49  ;;  %v1075_v24 = vsel %vm277_vm0, %v1047_v47, 0 }
 0x3bf   :  { %v1021_v32 = vadd.f32 %v1992_v40, %v993_v9 }
 0x3c1   :  { %v1037_v15 = vmax.f32 %v1021_v32, 0.0 }
 0x3c4   :  { %v900_v52 = vpop.f32.mrf.mxu3 }
 0x3c5   :  { %v995_v27 = vadd.f32 %v994_v51, %v900_v52 }
 0x3c7   :  { %v1022_v13 = vadd.f32 %v1992_v40, %v995_v27 }
 0x3c9   :  { %v1038_v16 = vmax.f32 %v1022_v13, 0.0 }
 0x3cb   :  { %v1048_v18 = vpack.c.bf16 %v1038_v16, %v1037_v15 }
 0x3cd   :  { %v1078_v22 = vsel %vm277_vm0, %v1048_v18, 0 }
 0x419   :  { %v1056_v33 = vpop.permute.xlu0 %1055 }
 0x41a   :  { %v1058_v34 = vperm.slane %v1056_v33, 0 }
 0x41d   :  { %v903_v54 = vpop.f32.mrf.mxu3 }
 0x41e   :  { %v998_v1 = vadd.f32 %v997_v53, %v903_v54 }
 0x420   :  { %v1023_v7 = vadd.f32 %v1992_v40, %v998_v1 }
 0x422   :  { %v1039_v12 = vmax.f32 %v1023_v7, 0.0 }
 0x425   :  { %v905_v56 = vpop.f32.mrf.mxu3 }
 0x426   :  { %v1000_v62 = vadd.f32 %v999_v55, %v905_v56  ;;  %v1125_v56 = vld [vmem:[%s2082_s22] sm:$0xff] }
 0x428   :  { %v1024_v3 = vadd.f32 %v1992_v40, %v1000_v62 }
 0x42a   :  { %v1040_v10 = vmax.f32 %v1024_v3, 0.0 }
 0x42c   :  { %v1049_v14 = vpack.c.bf16 %v1040_v10, %v1039_v12 }
 0x42d   :  { %v908_v58 = vpop.f32.mrf.mxu3 }
 0x42e   :  { %v1003_v59 = vadd.f32 %v1002_v57, %v908_v58  ;;  %v1081_v17 = vsel %vm277_vm0, %v1049_v14, 0 }
 0x430   :  { %v1025_v63 = vadd.f32 %v1992_v40, %v1003_v59 }
 0x432   :  { %v1041_v5 = vmax.f32 %v1025_v63, 0.0 }
 0x435   :  { %v910_v61 = vpop.f32.mrf.mxu3 }
 0x436   :  { %v1005_v0 = vadd.f32 %v1004_v60, %v910_v61 }
 0x438   :  { %v1026_v2 = vadd.f32 %v1992_v40, %v1005_v0  ;;  %v1069_v40 = vsel %vm277_vm0, %v2011_v19, 0 }
 0x43a   :  { %v1042_v6 = vmax.f32 %v1026_v2, 0.0 }
 0x43c   :  { %v1050_v8 = vpack.c.bf16 %v1042_v6, %v1041_v5 }
 0x43e   :  { %v1084_v11 = vsel %vm277_vm0, %v1050_v8, 0 }
 0x43f   :  { %1086 = vmatpush.bf16.xpose.msrb.mxu1 %v1084_v11 }
 0x447   :  { %1087 = vmatpush.bf16.xpose.msrb.mxu1 %v1081_v17 }
 0x44f   :  { %1088 = vmatpush.bf16.xpose.msrb.mxu1 %v1078_v22 }
 0x457   :  { %1089 = vmatpush.bf16.xpose.msrb.mxu1 %v1075_v24 }
 0x45f   :  { %1090 = vmatpush.bf16.xpose.msrb.mxu1 %v1072_v25 }
 0x467   :  { %1091 = vmatpush.bf16.xpose.msrb.mxu1 %v1069_v40 }
 0x46f   :  { %1092 = vmatpush.bf16.xpose.msrb.mxu1 %v1066_v28 }
 0x477   :  { %1093 = vmatpush.bf16.xpose.msrb.mxu1 %v1063_v29 }
 0x47e   :  { %1316 = vmatmul.msk.bf16.vlgmr.msrb.gmra.mxu1 %vm277_vm0, %v1051_v30 }
 0x4fb   :  { %v1095_v35 = vpop.f32.mrf.mxu1 }
 0x4fc   :  { %v1096_v36 = vadd.f32 %v1095_v35, %v1058_v34 }
 0x4fe   :  { %1099 = vst [vmem:[#allocation21] sm:$0x1] %v1096_v36  ;;  %v1100_v19 = vperm.slane %v1096_v36, 0 }
 0x4ff   :  { %1146 = dma.vmem_to_hbm [thread:$0]  %s1142_s4, 16, %s1144_s0, [#allocation6]  }
 0x500   :  { %v1101_v4 = vsel %vm795_vm1, %v1100_v19, -1e+30 }
 0x501   :  { %1102 = vmax.xlane.f32.xlu1 %v1101_v4 }
 0x503   :  { %v1097_v37 = vpop.f32.mrf.mxu1 }
 0x574   :  { %v1103_v38 = vpop.xlane.xlu1 %1102 }
 0x575   :  { %v1105_v39 = vmax.f32 %v1104_v50, %v1103_v38 }
 0x577   :  { %v1126_v41 = vsub.f32 %v1104_v50, %v1105_v39  ;;  %1133 = vst.msk [vmem:[%s2081_s21] sm:$0xff] %vm253_vm2, %v1105_v39  ;;  %1108 = vperm.xlu1 %1362, %v1105_v39  }
 0x579   :  { %v1127_v54 = vmul.f32 1.442695, %v1126_v41 }
 0x5e9   :  { %v1109_v42 = vpop.permute.xlu1 %1108 }
 0x5ea   :  { %v1111_v43 = vmul.f32 %v1915_v23, %v1109_v42 }
 0x5ec   :  { %v1112_v20 = vrot.slane %v1111_v43, 4 }
 0x5ee   :  { %v1113_v21 = vadd.f32 %v1112_v20, %v1111_v43 }
 0x5f0   :  { %v1114_v44 = vrot.slane %v1113_v21, 2 }
 0x5f2   :  { %v1115_v45 = vadd.f32 %v1114_v44, %v1113_v21 }
 0x5f4   :  { %v1116_v46 = vrot.slane %v1115_v45, 1 }
 0x5f6   :  { %v1117_v47 = vadd.f32 %v1116_v46, %v1115_v45 }
 0x5f8   :  { %v1118_v48 = vsub.f32 %v1096_v36, %v1117_v47 }
 0x5fa   :  { %v1119_v49 = vmul.f32 1.442695, %v1118_v48 }
 0x5fc   :  { %1371 = vpow2.f32 %v1119_v49 }
 0x5fd   :  { %1373 = vpow2.f32 %v1127_v54 }
 0x602   :  { %v1372_v51 = vpop.eup %1371 }
 0x603   :  { %v1121_v52 = vperm.slane %v1372_v51, 0  ;;  %v1374_v55 = vpop.eup %1373 }
 0x604   :  { %v1129_v57 = vmul.f32 %v1374_v55, %v1125_v56 }
 0x605   :  { %v1122_v53 = vmul.f32 %v1915_v23, %v1121_v52 }
 0x607   :  { %1123 = vadd.xlane.f32.xlu2 %v1122_v53 }
 0x67a   :  { %v1124_v58 = vpop.xlane.xlu2 %1123 }
 0x67b   :  { %v1130_v59 = vadd.f32 %v1129_v57, %v1124_v58 }
 0x67d   :  { %1132 = vst.msk [vmem:[%s2082_s22] sm:$0xff] %vm253_vm2, %v1130_v59 }
 0x67e   :  { %1651 = dma.done.wait [#allocation6], 16  }
 0x67f   :  { %1652 = vsyncadd [#allocation6], 4294967280 }
 0x680   :  { %1159 = vsyncpa [#allocation5], 1 }
 0x681   :  { %1160 = vsyncpa [#allocation8], 1 }
 0x682   :  { %1161 = vsyncpa [#allocation11], 1 }
 0x683   :  { %1162 = vsyncpa [#allocation14], 1 }
 0x684   :  { %1163 = vsyncpa [#allocation17], 1 }
 0x685   :  { %1164 = vsyncpa [#allocation20], 1 }
 0x686   :  { %1165 = vsyncpa [#allocation6], 1 }

</bundles_post_ra>
